<compile_context>
chip_gen: v7x
topology: tpu7x:2x2x1
jax: 0.10.0
libtpu: 0.0.40
codegen_flags: <defaults>
</compile_context>

<pallas_src>
import functools

import numpy as np
import jax
import jax.numpy as jnp
from jax.experimental import pallas as pl
from jax.experimental.pallas import tpu as pltpu  # noqa: F401  (TPU backend)

D_MODEL = 32
SEQ_LEN = 8
NUM_HEAD = 4
MLP_EXP = 4
BATCH = 2
LN_EPS = 1e-5
ATTN_SCALE = (D_MODEL // NUM_HEAD) ** -0.5
GROUPS = D_MODEL // SEQ_LEN          # channel groups induced by the reshape "scramble"
NEG_CROSS = -1.0e9                   # kills cross-batch entries in the stacked softmax

# Rows of the packed (16, 32) bias / LayerNorm slab
_B_A1, _B_A2 = 0, 4                  # + {0: q, 1: k, 2: v, 3: proj}
_B_LN1B, _B_LN2A, _B_LN2B = 8, 10, 12
_B_MLP_B2 = 14                       # + mlp index (0 or 1)


# ---------------------------------------------------------------------------
# In-kernel math helpers (traced inline into the single fused kernel)
# ---------------------------------------------------------------------------
def _erf(x):
    # TODO(synk): Mosaic has no native erf lowering; Abramowitz & Stegun 7.1.26
    # (|err| <= 1.5e-7) so GELU matches torch.nn.GELU() (exact erf) to f32 precision.
    a = jnp.abs(x)
    t = 1.0 / (1.0 + 0.3275911 * a)
    poly = ((((1.061405429 * t - 1.453152027) * t + 1.421413741) * t
             - 0.284496736) * t + 0.254829592) * t
    y = 1.0 - poly * jnp.exp(-a * a)
    return jnp.where(x >= 0.0, y, -y)


def _gelu_exact(x):
    return 0.5 * x * (1.0 + _erf(x * 0.7071067811865476))


# ---------------------------------------------------------------------------
# The single fused kernel for the whole TransformerBlock forward pass
# ---------------------------------------------------------------------------
def _block_kernel(x_ref, enc_ref, masks_ref, aw_ref, b32_ref,
                  mw1_ref, mw2_ref, mb1_ref, out_ref):
    S, G, B = SEQ_LEN, GROUPS, BATCH

    def row(i):                                   # (1, D) slice of the packed bias slab
        return b32_ref[i:i + 1, :]

    def layer_norm(v, i):                         # gamma = row(i), beta = row(i + 1)
        mean = jnp.mean(v, axis=-1, keepdims=True)
        vc = v - mean
        var = jnp.mean(vc * vc, axis=-1, keepdims=True)
        return vc * jax.lax.rsqrt(var + LN_EPS) * row(i) + row(i + 1)

    def mlp(v, i):
        h = jnp.dot(v, mw1_ref[i], preferred_element_type=jnp.float32) + mb1_ref[i:i + 1, :]
        h = _gelu_exact(h)
        return jnp.dot(h, mw2_ref[i], preferred_element_type=jnp.float32) + row(_B_MLP_B2 + i)

    def attention(xq, xkv, base, add_mask, mul_mask):
        """WindowMultiHeadAttention (dropout 0) on batch-stacked (B*S, D) rows.

        Scores are computed transposed and batch-stacked: st[gk, gq] with
        gk = b*S + k, gq = b*S + q.  `add_mask` carries (causal mask)^T * -1e6 on the
        in-batch diagonal blocks and -1e9 on the cross-batch blocks, so the softmax
        over axis 0 factorizes per batch exactly (cross terms underflow to 0).
        """
        qp = jnp.dot(xq, aw_ref[base + 0], preferred_element_type=jnp.float32) + row(base + 0)
        kp = jnp.dot(xkv, aw_ref[base + 1], preferred_element_type=jnp.float32) + row(base + 1)
        vp = jnp.dot(xkv, aw_ref[base + 2], preferred_element_type=jnp.float32) + row(base + 2)

        # st[gk, gq] = k_gk . q_gq   (one (16,32)x(32,16) MXU op for both batches)
        st = jax.lax.dot_general(kp, qp, (((1,), (1,)), ((), ())),
                                 preferred_element_type=jnp.float32)        # (B*S, B*S)
        st = st + add_mask
        m = jnp.max(st, axis=0, keepdims=True)
        e = jnp.exp(st - m)
        denom = jnp.sum(e, axis=0, keepdims=True)
        at = e * pl.reciprocal(denom, approx=True)    # attn^T, block-diagonal over batches
        if mul_mask is not None:
            at = at * mul_mask                        # faithful reference bug: attn *= mask

        # ctxT[e, b*S+q] = sum_k v_perm[b, k, e] * attn[b, q, k]  (cross-batch terms are 0)
        ctxT = jax.lax.dot_general(vp, at, (((0,), (0,)), ((), ())),
                                   preferred_element_type=jnp.float32)      # (D, B*S)

        # Undo the reference's `(attn @ v).transpose(1, 2).reshape(b, s, c)` scramble
        # (Wv columns were permuted on the host so groups are contiguous):
        #   m2[b*S + s', a*S + r] = ctxT[a*S + s', b*S + r]
        m2 = jnp.concatenate(
            [jnp.concatenate([ctxT[a * S:(a + 1) * S, b * S:(b + 1) * S]
                              for a in range(G)], axis=1)
             for b in range(B)], axis=0)                                     # (B*S, D)
        return jnp.dot(m2, aw_ref[base + 3], preferred_element_type=jnp.float32) + row(base + 3)

    x = x_ref[...]                                # (B*S, D) f32
    enc = enc_ref[...]
    add1 = masks_ref[0]                           # causal^T * -1e6 (+ cross-batch -1e9)
    mul1 = masks_ref[1]                           # causal^T on diag blocks, 0 elsewhere
    add2 = masks_ref[2]                           # cross-batch -1e9 only

    # Self-attention on the raw features (the reference's norm1a output is unused) + residual.
    x = x + attention(x, x, _B_A1, add1, mul1)
    # MLP1 on norm1b(x) + residual.
    x = x + mlp(layer_norm(x, _B_LN1B), 0)
    # Cross-attention: q from norm2a(x), k/v from enc_output, no causal mask, + residual.
    x = x + attention(layer_norm(x, _B_LN2A), enc, _B_A2, add2, None)
    # MLP2 on norm2b(x) + residual.
    x = x + mlp(layer_norm(x, _B_LN2B), 1)

    out_ref[...] = x


# ---------------------------------------------------------------------------
# Wrapper: one pallas_call for the whole block
# ---------------------------------------------------------------------------
@functools.partial(jax.jit, static_argnames=("training",))
def transformer_block_forward(features, enc_output, packed, training=True):
    """TransformerBlock.forward (style='decoder', drop_out_rate=drop_path_rate=0)."""
    del training  # StochasticDepth / Dropout are identity at rate 0.0
    if enc_output is None:
        # TODO(synk): enc_output=None (self-attention on the mid-block normed
        # activations) is not exercised by the decoder-style forward and is not
        # supported by the fused kernel.
        raise NotImplementedError("fused kernel requires enc_output")

    B, S, D = features.shape
    x2 = features.reshape(B * S, D)
    enc2 = enc_output.reshape(B * S, D)

    # Note: out last-dim (32) < 128 lanes -> masked store; negligible at this size.
    # If many such blocks are run, add a leading "parallel" grid axis so v7x's second
    # TensorCore is used (single block: no grid needed, everything fits in VMEM).
    out2 = pl.pallas_call(
        _block_kernel,
        out_shape=jax.ShapeDtypeStruct((B * S, D), jnp.float32),
    )(x2, enc2,
      packed["masks"], packed["attn_w"], packed["bias32"],
      packed["mlp_w1"], packed["mlp_w2"], packed["mlp_b1"])
    return out2.reshape(B, S, D)


# ---------------------------------------------------------------------------
# Parameter init (raw, PyTorch-like) and host-side packing for the fused kernel
# ---------------------------------------------------------------------------
def _init_linear(key, din, dout, scale=0.05):
    kw, kb = jax.random.split(key)
    return (scale * jax.random.normal(kw, (din, dout), jnp.float32),
            scale * jax.random.normal(kb, (dout,), jnp.float32))


def init_raw_params(key, d_model=D_MODEL, seq_len=SEQ_LEN, mlp_exp=MLP_EXP):
    keys = jax.random.split(key, 4)

    def attn_params(k):
        k1, k2, k3, k4 = jax.random.split(k, 4)
        wq, bq = _init_linear(k1, d_model, d_model)
        wk, bk = _init_linear(k2, d_model, d_model)
        wv, bv = _init_linear(k3, d_model, d_model)
        wp, bp = _init_linear(k4, d_model, d_model)
        return dict(wq=wq, bq=bq, wk=wk, bk=bk, wv=wv, bv=bv, wp=wp, bp=bp)

    def mlp_params(k):
        k1, k2 = jax.random.split(k)
        w1, b1 = _init_linear(k1, d_model, d_model * mlp_exp)
        w2, b2 = _init_linear(k2, d_model * mlp_exp, d_model)
        return dict(w1=w1, b1=b1, w2=w2, b2=b2)

    def ln_params():  # PyTorch LayerNorm default init
        return dict(gamma=jnp.ones((d_model,), jnp.float32),
                    beta=jnp.zeros((d_model,), jnp.float32))

    look_ahead_mask = jnp.triu(jnp.ones((seq_len, seq_len), jnp.float32), k=1)
    return dict(
        look_ahead_mask=look_ahead_mask,
        norm1a=ln_params(), norm1b=ln_params(),
        norm2a=ln_params(), norm2b=ln_params(),
        attn1=attn_params(keys[0]), attn2=attn_params(keys[1]),
        mlp1=mlp_params(keys[2]), mlp2=mlp_params(keys[3]),
    )


def pack_params(raw, d_model=D_MODEL, seq_len=SEQ_LEN, batch=BATCH):
    """One-time host-side packing:
       * fold the attention scale into Wq/bq,
       * permute Wv/bv columns so the reshape scramble reduces to contiguous blocks,
       * stack all weights / biases / masks into a handful of slabs (few DMAs)."""
    g = d_model // seq_len
    # new column a*S + s'  <-  old column g*s' + a
    perm = np.array([g * sp + a for a in range(g) for sp in range(seq_len)], np.int32)

    def attn_wb(p):
        ws = [p["wq"] * ATTN_SCALE, p["wk"], p["wv"][:, perm], p["wp"]]
        bs = [p["bq"] * ATTN_SCALE, p["bk"], p["bv"][perm], p["bp"]]
        return ws, bs

    w1, b1 = attn_wb(raw["attn1"])
    w2, b2 = attn_wb(raw["attn2"])
    attn_w = jnp.stack(w1 + w2, axis=0)                                   # (8, D, D)

    bias_rows = b1 + b2 + [
        raw["norm1b"]["gamma"], raw["norm1b"]["beta"],
        raw["norm2a"]["gamma"], raw["norm2a"]["beta"],
        raw["norm2b"]["gamma"], raw["norm2b"]["beta"],
        raw["mlp1"]["b2"], raw["mlp2"]["b2"],
    ]
    bias32 = jnp.stack(bias_rows, axis=0)                                 # (16, D)

    mlp_w1 = jnp.stack([raw["mlp1"]["w1"], raw["mlp2"]["w1"]], axis=0)    # (2, D, 4D)
    mlp_w2 = jnp.stack([raw["mlp1"]["w2"], raw["mlp2"]["w2"]], axis=0)    # (2, 4D, D)
    mlp_b1 = jnp.stack([raw["mlp1"]["b1"], raw["mlp2"]["b1"]], axis=0)    # (2, 4D)

    # Batch-stacked transposed masks: diagonal blocks are the per-batch causal mask^T,
    # off-diagonal (cross-batch) blocks get -1e9 so they vanish under the stacked softmax.
    eye_b = jnp.eye(batch, dtype=jnp.float32)
    same = jnp.kron(eye_b, jnp.ones((seq_len, seq_len), jnp.float32))
    cross = 1.0 - same
    maskT = raw["look_ahead_mask"].T
    add1 = jnp.kron(eye_b, maskT) * (-1000000.0) + cross * NEG_CROSS
    mul1 = jnp.kron(eye_b, maskT)
    add2 = cross * NEG_CROSS
    masks = jnp.stack([add1, mul1, add2], axis=0).astype(jnp.float32)     # (3, B*S, B*S)

    return dict(attn_w=attn_w, bias32=bias32, mlp_w1=mlp_w1, mlp_w2=mlp_w2,
                mlp_b1=mlp_b1, masks=masks)


# ---------------------------------------------------------------------------
# Pure-JAX reference (literal port of the PyTorch forward) for validation
# ---------------------------------------------------------------------------
def _reference_forward(features, enc_output, raw):
    hi = jax.lax.Precision.HIGHEST

    def linear(x, w, b):
        return jnp.dot(x, w, precision=hi) + b

    def ln(x, p):
        mean = jnp.mean(x, axis=-1, keepdims=True)
        var = jnp.mean((x - mean) ** 2, axis=-1, keepdims=True)
        return (x - mean) / jnp.sqrt(var + LN_EPS) * p["gamma"] + p["beta"]

    def mlp(x, p):
        h = linear(x, p["w1"], p["b1"])
        h = 0.5 * h * (1.0 + jax.scipy.special.erf(h / np.sqrt(2.0)))
        return linear(h, p["w2"], p["b2"])

    def wmha(v, k, q, p, mask):
        b, sq, c = q.shape
        blowup = v.shape[-2] // sq
        qp = linear(q, p["wq"], p["bq"]) * ATTN_SCALE
        kp = linear(k, p["wk"], p["bk"])
        vp = linear(v, p["wv"], p["bv"])
        attn = jnp.einsum("bqc,bkc->bqk", qp, kp, precision=hi)
        if mask is not None:
            attn = attn + jnp.tile(mask, (1, blowup)) * (-1000000.0)
        attn = jax.nn.softmax(attn, axis=-1)
        if mask is not None:
            attn = attn * jnp.tile(mask, (1, blowup))   # faithful reference bug
        feat = jnp.einsum("bqk,bkc->bqc", attn, vp, precision=hi)
        feat = jnp.swapaxes(feat, 1, 2).reshape(b, sq, c)  # reference scramble
        return linear(feat, p["wp"], p["bp"])

    mask = raw["look_ahead_mask"]
    x = features
    x = x + wmha(v=features, k=features, q=features, p=raw["attn1"], mask=mask)
    x = x + mlp(ln(x, raw["norm1b"]), raw["mlp1"])
    shortcut = x
    q_in = ln(x, raw["norm2a"])
    kv = enc_output if enc_output is not None else q_in
    x = shortcut + wmha(v=kv, k=kv, q=q_in, p=raw["attn2"], mask=None)
    return x + mlp(ln(x, raw["norm2b"]), raw["mlp2"])


if __name__ == "__main__":
    root = jax.random.PRNGKey(0)
    k_params, k_feat, k_enc = jax.random.split(root, 3)
    raw_params = init_raw_params(k_params)
    packed_params = pack_params(raw_params)

    features = jax.random.normal(k_feat, (BATCH, SEQ_LEN, D_MODEL), jnp.float32)
    enc_output = jax.random.normal(k_enc, (BATCH, SEQ_LEN, D_MODEL), jnp.float32)

    out = transformer_block_forward(features, enc_output, packed_params, training=True)
    out = jax.block_until_ready(out)

    assert out.shape == (BATCH, SEQ_LEN, D_MODEL), out.shape
    assert bool(jnp.all(jnp.isfinite(out)))

    ref = _reference_forward(features, enc_output, raw_params)
    max_err = float(jnp.max(jnp.abs(out - ref)))
    assert max_err < 5e-3, f"max abs err vs reference: {max_err}"
    print("KERNEL_OK")
</pallas_src>

<mosaic_0001>
module attributes {stable_mosaic.version = 11 : i64} {
  func.func @_block_kernel(%arg0: memref<16x32xf32, #tpu.memory_space<vmem>>, %arg1: memref<16x32xf32, #tpu.memory_space<vmem>>, %arg2: memref<3x16x16xf32, #tpu.memory_space<vmem>>, %arg3: memref<8x32x32xf32, #tpu.memory_space<vmem>>, %arg4: memref<16x32xf32, #tpu.memory_space<vmem>>, %arg5: memref<2x32x128xf32, #tpu.memory_space<vmem>>, %arg6: memref<2x128x32xf32, #tpu.memory_space<vmem>>, %arg7: memref<2x128xf32, #tpu.memory_space<vmem>>, %arg8: memref<16x32xf32, #tpu.memory_space<vmem>>) attributes {dimension_semantics = [], scalar_prefetch = 0 : i64, scratch_operands = 0 : i64, tpu.core_type = #tpu.core_type<tc>} {
    %c0 = arith.constant 0 : index
    %c0_0 = arith.constant 0 : index
    %0 = vector.load %arg0[%c0, %c0_0] : memref<16x32xf32, #tpu.memory_space<vmem>>, vector<16x32xf32>
    %c0_1 = arith.constant 0 : index
    %c0_2 = arith.constant 0 : index
    %1 = vector.load %arg1[%c0_1, %c0_2] : memref<16x32xf32, #tpu.memory_space<vmem>>, vector<16x32xf32>
    %c0_3 = arith.constant 0 : index
    %c0_4 = arith.constant 0 : index
    %c0_5 = arith.constant 0 : index
    %2 = vector.load %arg2[%c0_3, %c0_4, %c0_5] : memref<3x16x16xf32, #tpu.memory_space<vmem>>, vector<1x16x16xf32>
    %3 = vector.shape_cast %2 : vector<1x16x16xf32> to vector<16x16xf32>
    %c1 = arith.constant 1 : index
    %c0_6 = arith.constant 0 : index
    %c0_7 = arith.constant 0 : index
    %4 = vector.load %arg2[%c1, %c0_6, %c0_7] : memref<3x16x16xf32, #tpu.memory_space<vmem>>, vector<1x16x16xf32>
    %5 = vector.shape_cast %4 : vector<1x16x16xf32> to vector<16x16xf32>
    %c2 = arith.constant 2 : index
    %c0_8 = arith.constant 0 : index
    %c0_9 = arith.constant 0 : index
    %6 = vector.load %arg2[%c2, %c0_8, %c0_9] : memref<3x16x16xf32, #tpu.memory_space<vmem>>, vector<1x16x16xf32>
    %7 = vector.shape_cast %6 : vector<1x16x16xf32> to vector<16x16xf32>
    %c0_10 = arith.constant 0 : index
    %c0_11 = arith.constant 0 : index
    %c0_12 = arith.constant 0 : index
    %8 = vector.load %arg3[%c0_10, %c0_11, %c0_12] : memref<8x32x32xf32, #tpu.memory_space<vmem>>, vector<1x32x32xf32>
    %9 = vector.shape_cast %8 : vector<1x32x32xf32> to vector<32x32xf32>
    %cst = arith.constant dense<0.000000e+00> : vector<16x32xf32>
    %10 = tpu.matmul %0, %9, %cst {dimension_numbers = #tpu.dot_dimension_numbers<[1], [0], [0], [1], [0, 0, 1, 1], [], []>} : vector<16x32xf32>, vector<32x32xf32>, vector<16x32xf32> -> vector<16x32xf32>
    %c0_13 = arith.constant 0 : index
    %c0_14 = arith.constant 0 : index
    %11 = vector.load %arg4[%c0_13, %c0_14] : memref<16x32xf32, #tpu.memory_space<vmem>>, vector<1x32xf32>
    %12 = vector.broadcast %11 : vector<1x32xf32> to vector<16x32xf32>
    %13 = arith.addf %10, %12 : vector<16x32xf32>
    %c1_15 = arith.constant 1 : index
    %c0_16 = arith.constant 0 : index
    %c0_17 = arith.constant 0 : index
    %14 = vector.load %arg3[%c1_15, %c0_16, %c0_17] : memref<8x32x32xf32, #tpu.memory_space<vmem>>, vector<1x32x32xf32>
    %15 = vector.shape_cast %14 : vector<1x32x32xf32> to vector<32x32xf32>
    %cst_18 = arith.constant dense<0.000000e+00> : vector<16x32xf32>
    %16 = tpu.matmul %0, %15, %cst_18 {dimension_numbers = #tpu.dot_dimension_numbers<[1], [0], [0], [1], [0, 0, 1, 1], [], []>} : vector<16x32xf32>, vector<32x32xf32>, vector<16x32xf32> -> vector<16x32xf32>
    %c1_19 = arith.constant 1 : index
    %c0_20 = arith.constant 0 : index
    %17 = vector.load %arg4[%c1_19, %c0_20] : memref<16x32xf32, #tpu.memory_space<vmem>>, vector<1x32xf32>
    %18 = vector.broadcast %17 : vector<1x32xf32> to vector<16x32xf32>
    %19 = arith.addf %16, %18 : vector<16x32xf32>
    %c2_21 = arith.constant 2 : index
    %c0_22 = arith.constant 0 : index
    %c0_23 = arith.constant 0 : index
    %20 = vector.load %arg3[%c2_21, %c0_22, %c0_23] : memref<8x32x32xf32, #tpu.memory_space<vmem>>, vector<1x32x32xf32>
    %21 = vector.shape_cast %20 : vector<1x32x32xf32> to vector<32x32xf32>
    %cst_24 = arith.constant dense<0.000000e+00> : vector<16x32xf32>
    %22 = tpu.matmul %0, %21, %cst_24 {dimension_numbers = #tpu.dot_dimension_numbers<[1], [0], [0], [1], [0, 0, 1, 1], [], []>} : vector<16x32xf32>, vector<32x32xf32>, vector<16x32xf32> -> vector<16x32xf32>
    %c2_25 = arith.constant 2 : index
    %c0_26 = arith.constant 0 : index
    %23 = vector.load %arg4[%c2_25, %c0_26] : memref<16x32xf32, #tpu.memory_space<vmem>>, vector<1x32xf32>
    %24 = vector.broadcast %23 : vector<1x32xf32> to vector<16x32xf32>
    %25 = arith.addf %22, %24 : vector<16x32xf32>
    %cst_27 = arith.constant dense<0.000000e+00> : vector<16x16xf32>
    %26 = tpu.matmul %19, %13, %cst_27 {dimension_numbers = #tpu.dot_dimension_numbers<[1], [1], [0], [0], [0, 0, 1, 0], [], []>} : vector<16x32xf32>, vector<16x32xf32>, vector<16x16xf32> -> vector<16x16xf32>
    %27 = arith.addf %26, %3 : vector<16x16xf32>
    %cst_28 = arith.constant dense<0xFF800000> : vector<16xf32>
    %28 = vector.multi_reduction <maximumf>, %27, %cst_28 [0] : vector<16x16xf32> to vector<16xf32>
    %29 = vector.shape_cast %28 : vector<16xf32> to vector<1x16xf32>
    %30 = vector.broadcast %29 : vector<1x16xf32> to vector<16x16xf32>
    %31 = arith.subf %27, %30 : vector<16x16xf32>
    %32 = math.exp %31 : vector<16x16xf32>
    %cst_29 = arith.constant dense<0.000000e+00> : vector<16xf32>
    %33 = vector.multi_reduction <add>, %32, %cst_29 [0] : vector<16x16xf32> to vector<16xf32>
    %34 = vector.shape_cast %33 : vector<16xf32> to vector<1x16xf32>
    %35 = tpu.reciprocal %34 {approx = true} : vector<1x16xf32> -> vector<1x16xf32>
    %36 = vector.broadcast %35 : vector<1x16xf32> to vector<16x16xf32>
    %37 = arith.mulf %32, %36 : vector<16x16xf32>
    %38 = arith.mulf %37, %5 : vector<16x16xf32>
    %cst_30 = arith.constant dense<0.000000e+00> : vector<32x16xf32>
    %39 = tpu.matmul %25, %38, %cst_30 {dimension_numbers = #tpu.dot_dimension_numbers<[0], [0], [1], [1], [0, 1, 1, 1], [], []>} : vector<16x32xf32>, vector<16x16xf32>, vector<32x16xf32> -> vector<32x16xf32>
    %40 = vector.extract_strided_slice %39 {offsets = [0, 0], sizes = [8, 8], strides = [1, 1]} : vector<32x16xf32> to vector<8x8xf32>
    %41 = vector.extract_strided_slice %39 {offsets = [8, 0], sizes = [8, 8], strides = [1, 1]} : vector<32x16xf32> to vector<8x8xf32>
    %42 = vector.extract_strided_slice %39 {offsets = [16, 0], sizes = [8, 8], strides = [1, 1]} : vector<32x16xf32> to vector<8x8xf32>
    %43 = vector.extract_strided_slice %39 {offsets = [24, 0], sizes = [8, 8], strides = [1, 1]} : vector<32x16xf32> to vector<8x8xf32>
    %44 = tpu.concatenate %40, %41, %42, %43 in 1 : vector<8x8xf32>, vector<8x8xf32>, vector<8x8xf32>, vector<8x8xf32> -> vector<8x32xf32>
    %45 = vector.extract_strided_slice %39 {offsets = [0, 8], sizes = [8, 8], strides = [1, 1]} : vector<32x16xf32> to vector<8x8xf32>
    %46 = vector.extract_strided_slice %39 {offsets = [8, 8], sizes = [8, 8], strides = [1, 1]} : vector<32x16xf32> to vector<8x8xf32>
    %47 = vector.extract_strided_slice %39 {offsets = [16, 8], sizes = [8, 8], strides = [1, 1]} : vector<32x16xf32> to vector<8x8xf32>
    %48 = vector.extract_strided_slice %39 {offsets = [24, 8], sizes = [8, 8], strides = [1, 1]} : vector<32x16xf32> to vector<8x8xf32>
    %49 = tpu.concatenate %45, %46, %47, %48 in 1 : vector<8x8xf32>, vector<8x8xf32>, vector<8x8xf32>, vector<8x8xf32> -> vector<8x32xf32>
    %50 = tpu.concatenate %44, %49 in 0 : vector<8x32xf32>, vector<8x32xf32> -> vector<16x32xf32>
    %c3 = arith.constant 3 : index
    %c0_31 = arith.constant 0 : index
    %c0_32 = arith.constant 0 : index
    %51 = vector.load %arg3[%c3, %c0_31, %c0_32] : memref<8x32x32xf32, #tpu.memory_space<vmem>>, vector<1x32x32xf32>
    %52 = vector.shape_cast %51 : vector<1x32x32xf32> to vector<32x32xf32>
    %cst_33 = arith.constant dense<0.000000e+00> : vector<16x32xf32>
    %53 = tpu.matmul %50, %52, %cst_33 {dimension_numbers = #tpu.dot_dimension_numbers<[1], [0], [0], [1], [0, 0, 1, 1], [], []>} : vector<16x32xf32>, vector<32x32xf32>, vector<16x32xf32> -> vector<16x32xf32>
    %c3_34 = arith.constant 3 : index
    %c0_35 = arith.constant 0 : index
    %54 = vector.load %arg4[%c3_34, %c0_35] : memref<16x32xf32, #tpu.memory_space<vmem>>, vector<1x32xf32>
    %55 = vector.broadcast %54 : vector<1x32xf32> to vector<16x32xf32>
    %56 = arith.addf %53, %55 : vector<16x32xf32>
    %57 = arith.addf %0, %56 : vector<16x32xf32>
    %cst_36 = arith.constant dense<0.000000e+00> : vector<16xf32>
    %58 = vector.multi_reduction <add>, %57, %cst_36 [1] : vector<16x32xf32> to vector<16xf32>
    %59 = vector.shape_cast %58 : vector<16xf32> to vector<16x1xf32>
    %cst_37 = arith.constant 3.200000e+01 : f32
    %60 = vector.broadcast %cst_37 : f32 to vector<16x1xf32>
    %61 = arith.divf %59, %60 : vector<16x1xf32>
    %62 = vector.broadcast %61 : vector<16x1xf32> to vector<16x32xf32>
    %63 = arith.subf %57, %62 : vector<16x32xf32>
    %64 = arith.mulf %63, %63 : vector<16x32xf32>
    %cst_38 = arith.constant dense<0.000000e+00> : vector<16xf32>
    %65 = vector.multi_reduction <add>, %64, %cst_38 [1] : vector<16x32xf32> to vector<16xf32>
    %66 = vector.shape_cast %65 : vector<16xf32> to vector<16x1xf32>
    %cst_39 = arith.constant 3.200000e+01 : f32
    %67 = vector.broadcast %cst_39 : f32 to vector<16x1xf32>
    %68 = arith.divf %66, %67 : vector<16x1xf32>
    %cst_40 = arith.constant 9.99999974E-6 : f32
    %69 = vector.broadcast %cst_40 : f32 to vector<16x1xf32>
    %70 = arith.addf %68, %69 : vector<16x1xf32>
    %71 = math.rsqrt %70 : vector<16x1xf32>
    %72 = vector.broadcast %71 : vector<16x1xf32> to vector<16x32xf32>
    %73 = arith.mulf %63, %72 : vector<16x32xf32>
    %c8 = arith.constant 8 : index
    %c0_41 = arith.constant 0 : index
    %74 = vector.load %arg4[%c8, %c0_41] : memref<16x32xf32, #tpu.memory_space<vmem>>, vector<1x32xf32>
    %75 = vector.broadcast %74 : vector<1x32xf32> to vector<16x32xf32>
    %76 = arith.mulf %73, %75 : vector<16x32xf32>
    %c9 = arith.constant 9 : index
    %c0_42 = arith.constant 0 : index
    %77 = vector.load %arg4[%c9, %c0_42] : memref<16x32xf32, #tpu.memory_space<vmem>>, vector<1x32xf32>
    %78 = vector.broadcast %77 : vector<1x32xf32> to vector<16x32xf32>
    %79 = arith.addf %76, %78 : vector<16x32xf32>
    %c0_43 = arith.constant 0 : index
    %c0_44 = arith.constant 0 : index
    %c0_45 = arith.constant 0 : index
    %80 = vector.load %arg5[%c0_43, %c0_44, %c0_45] : memref<2x32x128xf32, #tpu.memory_space<vmem>>, vector<1x32x128xf32>
    %81 = vector.shape_cast %80 : vector<1x32x128xf32> to vector<32x128xf32>
    %cst_46 = arith.constant dense<0.000000e+00> : vector<16x128xf32>
    %82 = tpu.matmul %79, %81, %cst_46 {dimension_numbers = #tpu.dot_dimension_numbers<[1], [0], [0], [1], [0, 0, 1, 1], [], []>} : vector<16x32xf32>, vector<32x128xf32>, vector<16x128xf32> -> vector<16x128xf32>
    %c0_47 = arith.constant 0 : index
    %c0_48 = arith.constant 0 : index
    %83 = vector.load %arg7[%c0_47, %c0_48] : memref<2x128xf32, #tpu.memory_space<vmem>>, vector<1x128xf32>
    %84 = vector.broadcast %83 : vector<1x128xf32> to vector<16x128xf32>
    %85 = arith.addf %82, %84 : vector<16x128xf32>
    %cst_49 = arith.constant 5.000000e-01 : f32
    %86 = vector.broadcast %cst_49 : f32 to vector<16x128xf32>
    %87 = arith.mulf %86, %85 : vector<16x128xf32>
    %cst_50 = arith.constant 0.707106769 : f32
    %88 = vector.broadcast %cst_50 : f32 to vector<16x128xf32>
    %89 = arith.mulf %85, %88 : vector<16x128xf32>
    %90 = math.absf %89 : vector<16x128xf32>
    %cst_51 = arith.constant 0.327591091 : f32
    %91 = vector.broadcast %cst_51 : f32 to vector<16x128xf32>
    %92 = arith.mulf %91, %90 : vector<16x128xf32>
    %cst_52 = arith.constant 1.000000e+00 : f32
    %93 = vector.broadcast %cst_52 : f32 to vector<16x128xf32>
    %94 = arith.addf %93, %92 : vector<16x128xf32>
    %cst_53 = arith.constant 1.000000e+00 : f32
    %95 = vector.broadcast %cst_53 : f32 to vector<16x128xf32>
    %96 = arith.divf %95, %94 : vector<16x128xf32>
    %cst_54 = arith.constant 1.06140542 : f32
    %97 = vector.broadcast %cst_54 : f32 to vector<16x128xf32>
    %98 = arith.mulf %97, %96 : vector<16x128xf32>
    %cst_55 = arith.constant 1.45315206 : f32
    %99 = vector.broadcast %cst_55 : f32 to vector<16x128xf32>
    %100 = arith.subf %98, %99 : vector<16x128xf32>
    %101 = arith.mulf %100, %96 : vector<16x128xf32>
    %cst_56 = arith.constant 1.42141378 : f32
    %102 = vector.broadcast %cst_56 : f32 to vector<16x128xf32>
    %103 = arith.addf %101, %102 : vector<16x128xf32>
    %104 = arith.mulf %103, %96 : vector<16x128xf32>
    %cst_57 = arith.constant 0.284496725 : f32
    %105 = vector.broadcast %cst_57 : f32 to vector<16x128xf32>
    %106 = arith.subf %104, %105 : vector<16x128xf32>
    %107 = arith.mulf %106, %96 : vector<16x128xf32>
    %cst_58 = arith.constant 0.254829586 : f32
    %108 = vector.broadcast %cst_58 : f32 to vector<16x128xf32>
    %109 = arith.addf %107, %108 : vector<16x128xf32>
    %110 = arith.mulf %109, %96 : vector<16x128xf32>
    %cst_59 = arith.constant 0.000000e+00 : f32
    %111 = vector.broadcast %cst_59 : f32 to vector<16x128xf32>
    %112 = arith.subf %111, %90 : vector<16x128xf32>
    %113 = arith.mulf %112, %90 : vector<16x128xf32>
    %114 = math.exp %113 : vector<16x128xf32>
    %115 = arith.mulf %110, %114 : vector<16x128xf32>
    %cst_60 = arith.constant 1.000000e+00 : f32
    %116 = vector.broadcast %cst_60 : f32 to vector<16x128xf32>
    %117 = arith.subf %116, %115 : vector<16x128xf32>
    %cst_61 = arith.constant 0.000000e+00 : f32
    %118 = vector.broadcast %cst_61 : f32 to vector<16x128xf32>
    %119 = arith.cmpf oge, %89, %118 : vector<16x128xf32>
    %cst_62 = arith.constant 0.000000e+00 : f32
    %120 = vector.broadcast %cst_62 : f32 to vector<16x128xf32>
    %121 = arith.subf %120, %117 : vector<16x128xf32>
    %122 = arith.select %119, %117, %121 : vector<16x128xi1>, vector<16x128xf32>
    %cst_63 = arith.constant 1.000000e+00 : f32
    %123 = vector.broadcast %cst_63 : f32 to vector<16x128xf32>
    %124 = arith.addf %123, %122 : vector<16x128xf32>
    %125 = arith.mulf %87, %124 : vector<16x128xf32>
    %c0_64 = arith.constant 0 : index
    %c0_65 = arith.constant 0 : index
    %c0_66 = arith.constant 0 : index
    %126 = vector.load %arg6[%c0_64, %c0_65, %c0_66] : memref<2x128x32xf32, #tpu.memory_space<vmem>>, vector<1x128x32xf32>
    %127 = vector.shape_cast %126 : vector<1x128x32xf32> to vector<128x32xf32>
    %cst_67 = arith.constant dense<0.000000e+00> : vector<16x32xf32>
    %128 = tpu.matmul %125, %127, %cst_67 {dimension_numbers = #tpu.dot_dimension_numbers<[1], [0], [0], [1], [0, 0, 1, 1], [], []>} : vector<16x128xf32>, vector<128x32xf32>, vector<16x32xf32> -> vector<16x32xf32>
    %c14 = arith.constant 14 : index
    %c0_68 = arith.constant 0 : index
    %129 = vector.load %arg4[%c14, %c0_68] : memref<16x32xf32, #tpu.memory_space<vmem>>, vector<1x32xf32>
    %130 = vector.broadcast %129 : vector<1x32xf32> to vector<16x32xf32>
    %131 = arith.addf %128, %130 : vector<16x32xf32>
    %132 = arith.addf %57, %131 : vector<16x32xf32>
    %cst_69 = arith.constant dense<0.000000e+00> : vector<16xf32>
    %133 = vector.multi_reduction <add>, %132, %cst_69 [1] : vector<16x32xf32> to vector<16xf32>
    %134 = vector.shape_cast %133 : vector<16xf32> to vector<16x1xf32>
    %cst_70 = arith.constant 3.200000e+01 : f32
    %135 = vector.broadcast %cst_70 : f32 to vector<16x1xf32>
    %136 = arith.divf %134, %135 : vector<16x1xf32>
    %137 = vector.broadcast %136 : vector<16x1xf32> to vector<16x32xf32>
    %138 = arith.subf %132, %137 : vector<16x32xf32>
    %139 = arith.mulf %138, %138 : vector<16x32xf32>
    %cst_71 = arith.constant dense<0.000000e+00> : vector<16xf32>
    %140 = vector.multi_reduction <add>, %139, %cst_71 [1] : vector<16x32xf32> to vector<16xf32>
    %141 = vector.shape_cast %140 : vector<16xf32> to vector<16x1xf32>
    %cst_72 = arith.constant 3.200000e+01 : f32
    %142 = vector.broadcast %cst_72 : f32 to vector<16x1xf32>
    %143 = arith.divf %141, %142 : vector<16x1xf32>
    %cst_73 = arith.constant 9.99999974E-6 : f32
    %144 = vector.broadcast %cst_73 : f32 to vector<16x1xf32>
    %145 = arith.addf %143, %144 : vector<16x1xf32>
    %146 = math.rsqrt %145 : vector<16x1xf32>
    %147 = vector.broadcast %146 : vector<16x1xf32> to vector<16x32xf32>
    %148 = arith.mulf %138, %147 : vector<16x32xf32>
    %c10 = arith.constant 10 : index
    %c0_74 = arith.constant 0 : index
    %149 = vector.load %arg4[%c10, %c0_74] : memref<16x32xf32, #tpu.memory_space<vmem>>, vector<1x32xf32>
    %150 = vector.broadcast %149 : vector<1x32xf32> to vector<16x32xf32>
    %151 = arith.mulf %148, %150 : vector<16x32xf32>
    %c11 = arith.constant 11 : index
    %c0_75 = arith.constant 0 : index
    %152 = vector.load %arg4[%c11, %c0_75] : memref<16x32xf32, #tpu.memory_space<vmem>>, vector<1x32xf32>
    %153 = vector.broadcast %152 : vector<1x32xf32> to vector<16x32xf32>
    %154 = arith.addf %151, %153 : vector<16x32xf32>
    %c4 = arith.constant 4 : index
    %c0_76 = arith.constant 0 : index
    %c0_77 = arith.constant 0 : index
    %155 = vector.load %arg3[%c4, %c0_76, %c0_77] : memref<8x32x32xf32, #tpu.memory_space<vmem>>, vector<1x32x32xf32>
    %156 = vector.shape_cast %155 : vector<1x32x32xf32> to vector<32x32xf32>
    %cst_78 = arith.constant dense<0.000000e+00> : vector<16x32xf32>
    %157 = tpu.matmul %154, %156, %cst_78 {dimension_numbers = #tpu.dot_dimension_numbers<[1], [0], [0], [1], [0, 0, 1, 1], [], []>} : vector<16x32xf32>, vector<32x32xf32>, vector<16x32xf32> -> vector<16x32xf32>
    %c4_79 = arith.constant 4 : index
    %c0_80 = arith.constant 0 : index
    %158 = vector.load %arg4[%c4_79, %c0_80] : memref<16x32xf32, #tpu.memory_space<vmem>>, vector<1x32xf32>
    %159 = vector.broadcast %158 : vector<1x32xf32> to vector<16x32xf32>
    %160 = arith.addf %157, %159 : vector<16x32xf32>
    %c5 = arith.constant 5 : index
    %c0_81 = arith.constant 0 : index
    %c0_82 = arith.constant 0 : index
    %161 = vector.load %arg3[%c5, %c0_81, %c0_82] : memref<8x32x32xf32, #tpu.memory_space<vmem>>, vector<1x32x32xf32>
    %162 = vector.shape_cast %161 : vector<1x32x32xf32> to vector<32x32xf32>
    %cst_83 = arith.constant dense<0.000000e+00> : vector<16x32xf32>
    %163 = tpu.matmul %1, %162, %cst_83 {dimension_numbers = #tpu.dot_dimension_numbers<[1], [0], [0], [1], [0, 0, 1, 1], [], []>} : vector<16x32xf32>, vector<32x32xf32>, vector<16x32xf32> -> vector<16x32xf32>
    %c5_84 = arith.constant 5 : index
    %c0_85 = arith.constant 0 : index
    %164 = vector.load %arg4[%c5_84, %c0_85] : memref<16x32xf32, #tpu.memory_space<vmem>>, vector<1x32xf32>
    %165 = vector.broadcast %164 : vector<1x32xf32> to vector<16x32xf32>
    %166 = arith.addf %163, %165 : vector<16x32xf32>
    %c6 = arith.constant 6 : index
    %c0_86 = arith.constant 0 : index
    %c0_87 = arith.constant 0 : index
    %167 = vector.load %arg3[%c6, %c0_86, %c0_87] : memref<8x32x32xf32, #tpu.memory_space<vmem>>, vector<1x32x32xf32>
    %168 = vector.shape_cast %167 : vector<1x32x32xf32> to vector<32x32xf32>
    %cst_88 = arith.constant dense<0.000000e+00> : vector<16x32xf32>
    %169 = tpu.matmul %1, %168, %cst_88 {dimension_numbers = #tpu.dot_dimension_numbers<[1], [0], [0], [1], [0, 0, 1, 1], [], []>} : vector<16x32xf32>, vector<32x32xf32>, vector<16x32xf32> -> vector<16x32xf32>
    %c6_89 = arith.constant 6 : index
    %c0_90 = arith.constant 0 : index
    %170 = vector.load %arg4[%c6_89, %c0_90] : memref<16x32xf32, #tpu.memory_space<vmem>>, vector<1x32xf32>
    %171 = vector.broadcast %170 : vector<1x32xf32> to vector<16x32xf32>
    %172 = arith.addf %169, %171 : vector<16x32xf32>
    %cst_91 = arith.constant dense<0.000000e+00> : vector<16x16xf32>
    %173 = tpu.matmul %166, %160, %cst_91 {dimension_numbers = #tpu.dot_dimension_numbers<[1], [1], [0], [0], [0, 0, 1, 0], [], []>} : vector<16x32xf32>, vector<16x32xf32>, vector<16x16xf32> -> vector<16x16xf32>
    %174 = arith.addf %173, %7 : vector<16x16xf32>
    %cst_92 = arith.constant dense<0xFF800000> : vector<16xf32>
    %175 = vector.multi_reduction <maximumf>, %174, %cst_92 [0] : vector<16x16xf32> to vector<16xf32>
    %176 = vector.shape_cast %175 : vector<16xf32> to vector<1x16xf32>
    %177 = vector.broadcast %176 : vector<1x16xf32> to vector<16x16xf32>
    %178 = arith.subf %174, %177 : vector<16x16xf32>
    %179 = math.exp %178 : vector<16x16xf32>
    %cst_93 = arith.constant dense<0.000000e+00> : vector<16xf32>
    %180 = vector.multi_reduction <add>, %179, %cst_93 [0] : vector<16x16xf32> to vector<16xf32>
    %181 = vector.shape_cast %180 : vector<16xf32> to vector<1x16xf32>
    %182 = tpu.reciprocal %181 {approx = true} : vector<1x16xf32> -> vector<1x16xf32>
    %183 = vector.broadcast %182 : vector<1x16xf32> to vector<16x16xf32>
    %184 = arith.mulf %179, %183 : vector<16x16xf32>
    %cst_94 = arith.constant dense<0.000000e+00> : vector<32x16xf32>
    %185 = tpu.matmul %172, %184, %cst_94 {dimension_numbers = #tpu.dot_dimension_numbers<[0], [0], [1], [1], [0, 1, 1, 1], [], []>} : vector<16x32xf32>, vector<16x16xf32>, vector<32x16xf32> -> vector<32x16xf32>
    %186 = vector.extract_strided_slice %185 {offsets = [0, 0], sizes = [8, 8], strides = [1, 1]} : vector<32x16xf32> to vector<8x8xf32>
    %187 = vector.extract_strided_slice %185 {offsets = [8, 0], sizes = [8, 8], strides = [1, 1]} : vector<32x16xf32> to vector<8x8xf32>
    %188 = vector.extract_strided_slice %185 {offsets = [16, 0], sizes = [8, 8], strides = [1, 1]} : vector<32x16xf32> to vector<8x8xf32>
    %189 = vector.extract_strided_slice %185 {offsets = [24, 0], sizes = [8, 8], strides = [1, 1]} : vector<32x16xf32> to vector<8x8xf32>
    %190 = tpu.concatenate %186, %187, %188, %189 in 1 : vector<8x8xf32>, vector<8x8xf32>, vector<8x8xf32>, vector<8x8xf32> -> vector<8x32xf32>
    %191 = vector.extract_strided_slice %185 {offsets = [0, 8], sizes = [8, 8], strides = [1, 1]} : vector<32x16xf32> to vector<8x8xf32>
    %192 = vector.extract_strided_slice %185 {offsets = [8, 8], sizes = [8, 8], strides = [1, 1]} : vector<32x16xf32> to vector<8x8xf32>
    %193 = vector.extract_strided_slice %185 {offsets = [16, 8], sizes = [8, 8], strides = [1, 1]} : vector<32x16xf32> to vector<8x8xf32>
    %194 = vector.extract_strided_slice %185 {offsets = [24, 8], sizes = [8, 8], strides = [1, 1]} : vector<32x16xf32> to vector<8x8xf32>
    %195 = tpu.concatenate %191, %192, %193, %194 in 1 : vector<8x8xf32>, vector<8x8xf32>, vector<8x8xf32>, vector<8x8xf32> -> vector<8x32xf32>
    %196 = tpu.concatenate %190, %195 in 0 : vector<8x32xf32>, vector<8x32xf32> -> vector<16x32xf32>
    %c7 = arith.constant 7 : index
    %c0_95 = arith.constant 0 : index
    %c0_96 = arith.constant 0 : index
    %197 = vector.load %arg3[%c7, %c0_95, %c0_96] : memref<8x32x32xf32, #tpu.memory_space<vmem>>, vector<1x32x32xf32>
    %198 = vector.shape_cast %197 : vector<1x32x32xf32> to vector<32x32xf32>
    %cst_97 = arith.constant dense<0.000000e+00> : vector<16x32xf32>
    %199 = tpu.matmul %196, %198, %cst_97 {dimension_numbers = #tpu.dot_dimension_numbers<[1], [0], [0], [1], [0, 0, 1, 1], [], []>} : vector<16x32xf32>, vector<32x32xf32>, vector<16x32xf32> -> vector<16x32xf32>
    %c7_98 = arith.constant 7 : index
    %c0_99 = arith.constant 0 : index
    %200 = vector.load %arg4[%c7_98, %c0_99] : memref<16x32xf32, #tpu.memory_space<vmem>>, vector<1x32xf32>
    %201 = vector.broadcast %200 : vector<1x32xf32> to vector<16x32xf32>
    %202 = arith.addf %199, %201 : vector<16x32xf32>
    %203 = arith.addf %132, %202 : vector<16x32xf32>
    %cst_100 = arith.constant dense<0.000000e+00> : vector<16xf32>
    %204 = vector.multi_reduction <add>, %203, %cst_100 [1] : vector<16x32xf32> to vector<16xf32>
    %205 = vector.shape_cast %204 : vector<16xf32> to vector<16x1xf32>
    %cst_101 = arith.constant 3.200000e+01 : f32
    %206 = vector.broadcast %cst_101 : f32 to vector<16x1xf32>
    %207 = arith.divf %205, %206 : vector<16x1xf32>
    %208 = vector.broadcast %207 : vector<16x1xf32> to vector<16x32xf32>
    %209 = arith.subf %203, %208 : vector<16x32xf32>
    %210 = arith.mulf %209, %209 : vector<16x32xf32>
    %cst_102 = arith.constant dense<0.000000e+00> : vector<16xf32>
    %211 = vector.multi_reduction <add>, %210, %cst_102 [1] : vector<16x32xf32> to vector<16xf32>
    %212 = vector.shape_cast %211 : vector<16xf32> to vector<16x1xf32>
    %cst_103 = arith.constant 3.200000e+01 : f32
    %213 = vector.broadcast %cst_103 : f32 to vector<16x1xf32>
    %214 = arith.divf %212, %213 : vector<16x1xf32>
    %cst_104 = arith.constant 9.99999974E-6 : f32
    %215 = vector.broadcast %cst_104 : f32 to vector<16x1xf32>
    %216 = arith.addf %214, %215 : vector<16x1xf32>
    %217 = math.rsqrt %216 : vector<16x1xf32>
    %218 = vector.broadcast %217 : vector<16x1xf32> to vector<16x32xf32>
    %219 = arith.mulf %209, %218 : vector<16x32xf32>
    %c12 = arith.constant 12 : index
    %c0_105 = arith.constant 0 : index
    %220 = vector.load %arg4[%c12, %c0_105] : memref<16x32xf32, #tpu.memory_space<vmem>>, vector<1x32xf32>
    %221 = vector.broadcast %220 : vector<1x32xf32> to vector<16x32xf32>
    %222 = arith.mulf %219, %221 : vector<16x32xf32>
    %c13 = arith.constant 13 : index
    %c0_106 = arith.constant 0 : index
    %223 = vector.load %arg4[%c13, %c0_106] : memref<16x32xf32, #tpu.memory_space<vmem>>, vector<1x32xf32>
    %224 = vector.broadcast %223 : vector<1x32xf32> to vector<16x32xf32>
    %225 = arith.addf %222, %224 : vector<16x32xf32>
    %c1_107 = arith.constant 1 : index
    %c0_108 = arith.constant 0 : index
    %c0_109 = arith.constant 0 : index
    %226 = vector.load %arg5[%c1_107, %c0_108, %c0_109] : memref<2x32x128xf32, #tpu.memory_space<vmem>>, vector<1x32x128xf32>
    %227 = vector.shape_cast %226 : vector<1x32x128xf32> to vector<32x128xf32>
    %cst_110 = arith.constant dense<0.000000e+00> : vector<16x128xf32>
    %228 = tpu.matmul %225, %227, %cst_110 {dimension_numbers = #tpu.dot_dimension_numbers<[1], [0], [0], [1], [0, 0, 1, 1], [], []>} : vector<16x32xf32>, vector<32x128xf32>, vector<16x128xf32> -> vector<16x128xf32>
    %c1_111 = arith.constant 1 : index
    %c0_112 = arith.constant 0 : index
    %229 = vector.load %arg7[%c1_111, %c0_112] : memref<2x128xf32, #tpu.memory_space<vmem>>, vector<1x128xf32>
    %230 = vector.broadcast %229 : vector<1x128xf32> to vector<16x128xf32>
    %231 = arith.addf %228, %230 : vector<16x128xf32>
    %cst_113 = arith.constant 5.000000e-01 : f32
    %232 = vector.broadcast %cst_113 : f32 to vector<16x128xf32>
    %233 = arith.mulf %232, %231 : vector<16x128xf32>
    %cst_114 = arith.constant 0.707106769 : f32
    %234 = vector.broadcast %cst_114 : f32 to vector<16x128xf32>
    %235 = arith.mulf %231, %234 : vector<16x128xf32>
    %236 = math.absf %235 : vector<16x128xf32>
    %cst_115 = arith.constant 0.327591091 : f32
    %237 = vector.broadcast %cst_115 : f32 to vector<16x128xf32>
    %238 = arith.mulf %237, %236 : vector<16x128xf32>
    %cst_116 = arith.constant 1.000000e+00 : f32
    %239 = vector.broadcast %cst_116 : f32 to vector<16x128xf32>
    %240 = arith.addf %239, %238 : vector<16x128xf32>
    %cst_117 = arith.constant 1.000000e+00 : f32
    %241 = vector.broadcast %cst_117 : f32 to vector<16x128xf32>
    %242 = arith.divf %241, %240 : vector<16x128xf32>
    %cst_118 = arith.constant 1.06140542 : f32
    %243 = vector.broadcast %cst_118 : f32 to vector<16x128xf32>
    %244 = arith.mulf %243, %242 : vector<16x128xf32>
    %cst_119 = arith.constant 1.45315206 : f32
    %245 = vector.broadcast %cst_119 : f32 to vector<16x128xf32>
    %246 = arith.subf %244, %245 : vector<16x128xf32>
    %247 = arith.mulf %246, %242 : vector<16x128xf32>
    %cst_120 = arith.constant 1.42141378 : f32
    %248 = vector.broadcast %cst_120 : f32 to vector<16x128xf32>
    %249 = arith.addf %247, %248 : vector<16x128xf32>
    %250 = arith.mulf %249, %242 : vector<16x128xf32>
    %cst_121 = arith.constant 0.284496725 : f32
    %251 = vector.broadcast %cst_121 : f32 to vector<16x128xf32>
    %252 = arith.subf %250, %251 : vector<16x128xf32>
    %253 = arith.mulf %252, %242 : vector<16x128xf32>
    %cst_122 = arith.constant 0.254829586 : f32
    %254 = vector.broadcast %cst_122 : f32 to vector<16x128xf32>
    %255 = arith.addf %253, %254 : vector<16x128xf32>
    %256 = arith.mulf %255, %242 : vector<16x128xf32>
    %cst_123 = arith.constant 0.000000e+00 : f32
    %257 = vector.broadcast %cst_123 : f32 to vector<16x128xf32>
    %258 = arith.subf %257, %236 : vector<16x128xf32>
    %259 = arith.mulf %258, %236 : vector<16x128xf32>
    %260 = math.exp %259 : vector<16x128xf32>
    %261 = arith.mulf %256, %260 : vector<16x128xf32>
    %cst_124 = arith.constant 1.000000e+00 : f32
    %262 = vector.broadcast %cst_124 : f32 to vector<16x128xf32>
    %263 = arith.subf %262, %261 : vector<16x128xf32>
    %cst_125 = arith.constant 0.000000e+00 : f32
    %264 = vector.broadcast %cst_125 : f32 to vector<16x128xf32>
    %265 = arith.cmpf oge, %235, %264 : vector<16x128xf32>
    %cst_126 = arith.constant 0.000000e+00 : f32
    %266 = vector.broadcast %cst_126 : f32 to vector<16x128xf32>
    %267 = arith.subf %266, %263 : vector<16x128xf32>
    %268 = arith.select %265, %263, %267 : vector<16x128xi1>, vector<16x128xf32>
    %cst_127 = arith.constant 1.000000e+00 : f32
    %269 = vector.broadcast %cst_127 : f32 to vector<16x128xf32>
    %270 = arith.addf %269, %268 : vector<16x128xf32>
    %271 = arith.mulf %233, %270 : vector<16x128xf32>
    %c1_128 = arith.constant 1 : index
    %c0_129 = arith.constant 0 : index
    %c0_130 = arith.constant 0 : index
    %272 = vector.load %arg6[%c1_128, %c0_129, %c0_130] : memref<2x128x32xf32, #tpu.memory_space<vmem>>, vector<1x128x32xf32>
    %273 = vector.shape_cast %272 : vector<1x128x32xf32> to vector<128x32xf32>
    %cst_131 = arith.constant dense<0.000000e+00> : vector<16x32xf32>
    %274 = tpu.matmul %271, %273, %cst_131 {dimension_numbers = #tpu.dot_dimension_numbers<[1], [0], [0], [1], [0, 0, 1, 1], [], []>} : vector<16x128xf32>, vector<128x32xf32>, vector<16x32xf32> -> vector<16x32xf32>
    %c15 = arith.constant 15 : index
    %c0_132 = arith.constant 0 : index
    %275 = vector.load %arg4[%c15, %c0_132] : memref<16x32xf32, #tpu.memory_space<vmem>>, vector<1x32xf32>
    %276 = vector.broadcast %275 : vector<1x32xf32> to vector<16x32xf32>
    %277 = arith.addf %274, %276 : vector<16x32xf32>
    %278 = arith.addf %203, %277 : vector<16x32xf32>
    %c0_133 = arith.constant 0 : index
    %c0_134 = arith.constant 0 : index
    %279 = vector.load %arg8[%c0_133, %c0_134] : memref<16x32xf32, #tpu.memory_space<vmem>>, vector<16x32xf32>
    tpu.vector_store %arg8[%c0_133, %c0_134], %278 {strides = array<i32>} : memref<16x32xf32, #tpu.memory_space<vmem>>, vector<16x32xf32>,
    return
  }
}

</mosaic_0001>

<bundles_post_ra>
// kernel: transformer_block_forward.1
= control target key start
LH: loop header
LB: loop body
LE: loop exit
PB: predicated region body
PF: predicated region fallthrough
CT: control target
= control target key end

     0   :  { %13 = vsyncpa [#allocation3], 0  ;;  %s3244_s0 = inlined_call_operand.hbm [shape: f32[16,32], index: 0, kind: input, shape index: {}]   ;;  %s3245_s1 = inlined_call_operand.hbm [shape: f32[16,32], index: 1, kind: input, shape index: {}]   ;;  %s3246_s2 = inlined_call_operand.hbm [shape: f32[3,16,16], index: 2, kind: input, shape index: {}]   ;;  %s3247_s3 = inlined_call_operand.vmem [shape: f32[8,32,32], index: 3, kind: input, shape index: {}]   ;;  %s3248_s4 = inlined_call_operand.vmem [shape: f32[16,32], index: 4, kind: input, shape index: {}]   ;;  %s3249_s5 = inlined_call_operand.vmem [shape: f32[2,32,128], index: 5, kind: input, shape index: {}]   ;;  %s3250_s6 = inlined_call_operand.vmem [shape: f32[2,128,32], index: 6, kind: input, shape index: {}]   ;;  %s3251_s7 = inlined_call_operand.vmem [shape: f32[2,128], index: 7, kind: input, shape index: {}]   ;;  %s3252_s8 = inlined_call_operand.hbm [shape: f32[16,32], index: 8, kind: output, shape index: {}]  }
   0x1   :  { %14 = vsyncpa [#allocation6], 0 }
   0x2   :  { %15 = vsyncpa [#allocation4], 0  ;;  %s2719_s27 = smov [#allocation5]   ;;  %s2720_s29 = smov [#allocation2]  }
   0x3   :  { %s33_s28 = sshll.u32 %s2719_s27, 4  ;;  %s21_s30 = sshll.u32 %s2720_s29, 4  ;;  %s34_s28 = int_to_ptr.vmem [resolvable:$true] %s33_s28  ;;  %s2773_s30 = int_to_ptr.vmem [resolvable:$true] %s21_s30 }
   0x4   :  { %s2625_s11 = scalar_lea.hbm %s3245_s1, 256 }
   0x5   :  { %p2626_p0 = scmp.ne.s32.totalorder %s3245_s1, %s2625_s11  ;;  %p2629_p1 = scmp.lt.u32.totalorder %s2625_s11, %s3245_s1 }
   0x7   :  { %p2631_p2 = pnand %p2629_p1, %p2626_p0 }
   0x9   :  { %2634 = shalt.err (!%p2631_p2)
}
   0xa   :  { %s2635_s16 = scalar_lea.vmem %s34_s28, 256  ;;  %p2640_p4 = scmp.lt.s32.totalorder %s34_s28, %s34_s28 }
   0xb   :  { %p2636_p3 = scmp.ne.s32.totalorder %s34_s28, %s2635_s16  ;;  %p2641_p5 = scmp.lt.s32.totalorder %s2635_s16, %s2635_s16 }
   0xd   :  { %p2642_p6 = por %p2641_p5, %p2640_p4 }
   0xf   :  { %p2643_p7 = pnand %p2642_p6, %p2636_p3 }
  0x11   :  { %2646 = shalt.err (!%p2643_p7)
}
  0x12   :  { %s2721_s17 = smov 128   ;;  %s2722_s18 = smov 8  }
  0x13   :  { %39 = dma.hbm_to_vmem [thread:$0]  %s3245_s1, 256, %s34_s28, [#allocation6], %s2721_s17, %s2721_s17, %s2722_s18  }
  0x14   :  { %s2647_s23 = scalar_lea.hbm %s3244_s0, 256 }
  0x15   :  { %p2648_p8 = scmp.ne.s32.totalorder %s3244_s0, %s2647_s23  ;;  %p2651_p9 = scmp.lt.u32.totalorder %s2647_s23, %s3244_s0 }
  0x17   :  { %p2653_p10 = pnand %p2651_p9, %p2648_p8 }
  0x19   :  { %2656 = shalt.err (!%p2653_p10)
}
  0x1a   :  { %s2657_s29 = scalar_lea.vmem %s2773_s30, 256  ;;  %p2662_p12 = scmp.lt.s32.totalorder %s2773_s30, %s2773_s30 }
  0x1b   :  { %p2658_p11 = scmp.ne.s32.totalorder %s2773_s30, %s2657_s29  ;;  %p2663_p13 = scmp.lt.s32.totalorder %s2657_s29, %s2657_s29 }
  0x1d   :  { %p2664_p0 = por %p2663_p13, %p2662_p12 }
  0x1f   :  { %p2665_p1 = pnand %p2664_p0, %p2658_p11 }
  0x21   :  { %2668 = shalt.err (!%p2665_p1)
}
  0x22   :  { %27 = dma.hbm_to_vmem [thread:$0]  %s3244_s0, 256, %s2773_s30, [#allocation3], %s2721_s17, %s2721_s17, %s2722_s18  }
  0x23   :  { %s2723_s9 = smov [#allocation7]   ;;  %s2669_s13 = scalar_lea.hbm %s3246_s2, 768 }
  0x24   :  { %s45_s10 = sshll.u32 %s2723_s9, 4  ;;  %p2670_p2 = scmp.ne.s32.totalorder %s3246_s2, %s2669_s13  ;;  %s46_s10 = int_to_ptr.vmem [resolvable:$true] %s45_s10 }
  0x25   :  { %p2673_p3 = scmp.lt.u32.totalorder %s2669_s13, %s3246_s2 }
  0x27   :  { %p2675_p4 = pnand %p2673_p3, %p2670_p2 }
  0x29   :  { %2678 = shalt.err (!%p2675_p4)
}
  0x2a   :  { %s2679_s20 = scalar_lea.vmem %s46_s10, 768  ;;  %p2684_p6 = scmp.lt.s32.totalorder %s46_s10, %s46_s10 }
  0x2b   :  { %p2680_p5 = scmp.ne.s32.totalorder %s46_s10, %s2679_s20  ;;  %p2685_p7 = scmp.lt.s32.totalorder %s2679_s20, %s2679_s20 }
  0x2d   :  { %p2686_p8 = por %p2685_p7, %p2684_p6 }
  0x2f   :  { %p2687_p9 = pnand %p2686_p8, %p2680_p5 }
  0x31   :  { %2690 = shalt.err (!%p2687_p9)
}
  0x32   :  { %51 = dma.hbm_to_vmem [thread:$0]  %s3246_s2, 768, %s46_s10, [#allocation6], %s2721_s17, %s2721_s17, %s2722_s18  }
  0x33   :  { %2713 = dma.done.wait [#allocation3], 256  }
  0x34   :  { %2714 = vsyncadd [#allocation3], 4294967040 }
  0x35   :  { %2715 = dma.done.wait [#allocation6], 1024  }
  0x36   :  { %2716 = vsyncadd [#allocation6], 4294966272  ;;  %vm92_vm0 = vcmask 261120   ;;  %v83_v0 = vld [vmem:[%s3247_s3] sm:$0xff]  ;;  %v84_v1 = vld [vmem:[%s3247_s3 + $0x8] sm:$0xff]  ;;  %vm431_vm2 = vcmask 130048  }
  0x37   :  { %v85_v2 = vld [vmem:[%s3247_s3 + $0x10] sm:$0xff]  ;;  %v2411_v3 = vpack.c.bf16 %v84_v1, %v83_v0  ;;  %v86_v4 = vld [vmem:[%s3247_s3 + $0x18] sm:$0xff]  ;;  %v2837_v5 = vld [vmem:[#allocation2] sm:$0xff]  ;;  %s2724_s13 = smov 120   ;;  %s2725_s14 = smov 24   ;;  %vm602_vm3 = vcmask 64512  }
  0x38   :  { %v2415_v6 = vpack.c.bf16 %v86_v4, %v85_v2  ;;  %2205 = vmatprep.mubr.msk.f32.mxu1 %vm92_vm0, %v2837_v5  ;;  %v1974_v7 = vld [vmem:[%s3247_s3 + $0x20] sm:$0xff]  ;;  %v1975_v8 = vld [vmem:[%s3247_s3 + $0x28] sm:$0xff]  ;;  %v1976_v10 = vld [vmem:[%s3247_s3 + $0x30] sm:$0xff]  ;;  %s2726_s15 = smov 16   ;;  %vm605_vm4 = vcmask 195584   ;;  %s2727_s26 = smov [#allocation8]  }
  0x39   :  { %2412 = vmatprep.subr.bf16.mxu1 %v2411_v3  ;;  %v2419_v9 = vpack.c.bf16 %v1975_v8, %v1974_v7  ;;  %v1977_v11 = vld [vmem:[%s3247_s3 + $0x38] sm:$0xff]  ;;  %v2853_v12 = vld [vmem:[#allocation2 + $0x8] sm:$0xff]  ;;  %v1981_v14 = vld [vmem:[%s3247_s3 + $0x40] sm:$0xff]  ;;  %s1958_s27 = sshll.u32 %s2727_s26, 4  ;;  %s1959_s27 = int_to_ptr.vmem [resolvable:$true] %s1958_s27 }
  0x3a   :  { %2414 = vmatpush3.bf16.msra.mxu1 %v2411_v3  ;;  %v2423_v13 = vpack.c.bf16 %v1977_v11, %v1976_v10  ;;  %v1982_v15 = vld [vmem:[%s3247_s3 + $0x48] sm:$0xff]  ;;  %v1983_v17 = vld [vmem:[%s3247_s3 + $0x50] sm:$0xff]  ;;  %v1984_v18 = vld [vmem:[%s3247_s3 + $0x58] sm:$0xff]  ;;  %p2696_p11 = scmp.lt.s32.totalorder %s1959_s27, %s1959_s27 }
  0x3b   :  { %2416 = vmatprep.subr.bf16.mxu1 %v2415_v6  ;;  %v2427_v16 = vpack.c.bf16 %v1982_v15, %v1981_v14  ;;  %v2431_v19 = vpack.c.bf16 %v1984_v18, %v1983_v17  ;;  %v1971_v20 = vld [vmem:[%s3248_s4] ss:$0 sm:$0xff]  ;;  %vm2882_vm1 = vmpackc.low %vm92_vm0, %vm92_vm0  ;;  %v1978_v27 = vld [vmem:[%s3248_s4 + $0x1] ss:$0 sm:$0xff] }
  0x3c   :  { %v1985_v32 = vld [vmem:[%s3248_s4 + $0x2] ss:$0 sm:$0xff]  ;;  %v76_v38 = vld [vmem:[#allocation7 + $0x8] sm:$0xff]  ;;  %v78_v7 = vld [vmem:[#allocation7 + $0x10] sm:$0xff] }
  0x3d   :  { %v75_v39 = vld [vmem:[#allocation7] sm:$0xff]  ;;  %v79_v8 = vld [vmem:[#allocation7 + $0x18] sm:$0xff]  ;;  %v1997_v18 = vld [vmem:[%s3247_s3 + $0x68] sm:$0xff] }
  0x3e   :  { %2418 = vmatpush3.bf16.msra.mxu1 %v2415_v6  ;;  %v1996_v17 = vld [vmem:[%s3247_s3 + $0x60] sm:$0xff] }
  0x3f   :  { %2420 = vmatprep.subr.bf16.mxu1 %v2419_v9 }
  0x41   :  { %2206 = vmatmul.mubr.msk.f32.vlgmr.msra.gmra.mrb[0].mxu1 %vm92_vm0, %v2853_v12 }
  0x42   :  { %2422 = vmatpush3.bf16.msra.mxu1 %v2419_v9  ;;  %2216 = vmatprep.mubr.msk.f32.mxu1 %vm92_vm0, %v2837_v5 }
  0x43   :  { %2424 = vmatprep.subr.bf16.mxu1 %v2423_v13 }
  0x46   :  { %2426 = vmatpush3.bf16.msra.mxu1 %v2423_v13 }
  0x47   :  { %2428 = vmatprep.subr.bf16.mxu1 %v2427_v16 }
  0x49   :  { %2217 = vmatmul.mubr.msk.f32.vlgmr.msra.gmra.mrb[2].mxu1 %vm92_vm0, %v2853_v12 }
  0x4a   :  { %2430 = vmatpush3.bf16.msra.mxu1 %v2427_v16  ;;  %2227 = vmatprep.mubr.msk.f32.mxu1 %vm92_vm0, %v2837_v5 }
  0x4b   :  { %2432 = vmatprep.subr.bf16.mxu1 %v2431_v19 }
  0x4e   :  { %2434 = vmatpush3.bf16.msra.mxu1 %v2431_v19  ;;  %v2445_v19 = vpack.c.bf16 %v1997_v18, %v1996_v17  ;;  %v898_v17 = vld [vmem:[%s3250_s6] sm:$0xff]  ;;  %v899_v18 = vld [vmem:[%s3250_s6 + $0x8] sm:$0xff] }
  0x51   :  { %2228 = vmatmul.mubr.msk.f32.vlgmr.msra.gmra.mrb[4].mxu1 %vm92_vm0, %v2853_v12 }
 0x114   :  { %v2207_v21 = vpop.f32.mrb[0].mxu1 }
 0x115   :  { %v171_v22 = vadd.f32 %v2207_v21, %v1971_v20  ;;  %v165_v23 = vpop.f32.mrb[1].mxu1  ;;  %v1999_v21 = vld [vmem:[%s3247_s3 + $0x78] sm:$0xff] }
 0x116   :  { %v166_v24 = vadd.f32 %v1971_v20, %v165_v23  ;;  %v1998_v20 = vld [vmem:[%s3247_s3 + $0x70] sm:$0xff] }
 0x118   :  { %v2435_v26 = vpack.c.bf16 %v171_v22, %v166_v24  ;;  %v2449_v22 = vpack.c.bf16 %v1999_v21, %v1998_v20  ;;  %v900_v20 = vld [vmem:[%s3250_s6 + $0x10] sm:$0xff]  ;;  %v901_v21 = vld [vmem:[%s3250_s6 + $0x18] sm:$0xff] }
 0x11a   :  { %2437 = vmatprep.subr.msk.bf16.mxu1 %vm2882_vm1, %v2435_v26 }
 0x11b   :  { %2440 = vmatpush3.bf16.xpose.msk.msra.mxu1 %vm2882_vm1, %v2435_v26 }
 0x11c   :  { %v2218_v28 = vpop.f32.mrb[2].mxu1  ;;  %2446 = vmatprep.subr.bf16.mxu1 %v2445_v19 }
 0x11d   :  { %v250_v29 = vpop.f32.mrb[3].mxu1  ;;  %v256_v31 = vadd.f32 %v2218_v28, %v1978_v27 }
 0x11e   :  { %v251_v30 = vadd.f32 %v1978_v27, %v250_v29 }
 0x120   :  { %2234 = vmatprep.mubr.msk.f32.mxu1 %vm92_vm0, %v251_v30 }
 0x122   :  { %2235 = vmatmul.mubr.msk.f32.vlgmr.msra.gmra.mrb[6].mxu1 %vm92_vm0, %v256_v31 }
 0x123   :  { %2448 = vmatpush3.bf16.msra.mxu1 %v2445_v19  ;;  %v2461_v19 = vpack.c.bf16 %v899_v18, %v898_v17 }
 0x124   :  { %v2229_v33 = vpop.f32.mrb[4].mxu1  ;;  %2450 = vmatprep.subr.bf16.mxu1 %v2449_v22 }
 0x125   :  { %v335_v34 = vpop.f32.mrb[5].mxu1  ;;  %v341_v36 = vadd.f32 %v2229_v33, %v1985_v32 }
 0x126   :  { %v336_v35 = vadd.f32 %v1985_v32, %v335_v34 }
 0x127   :  { %2452 = vmatpush3.bf16.msra.mxu1 %v2449_v22  ;;  %v2465_v22 = vpack.c.bf16 %v901_v21, %v900_v20 }
 0x128   :  { %461 = vxpose.xlu0.b32.start [1/2] (short) (narrow) %v336_v35, 32  ;;  %2462 = vmatprep.subr.bf16.mxu1 %v2461_v19 }
 0x12c   :  { %462 = vxpose.xlu0.b32.end [2/2] (short) (narrow) %v341_v36, 32 }
 0x1a8   :  { %v477_v37 = vpop.trf.xlu0 }
 0x1a9   :  { %2241 = vmatprep.mubr.msk.f32.mxu0 %vm431_vm2, %v477_v37 }
 0x1ac   :  { %v478_v6 = vpop.trf.xlu0 }
 0x1b0   :  { %v479_v15 = vpop.trf.xlu0 }
 0x1b4   :  { %v480_v16 = vpop.trf.xlu0 }
 0x1f5   :  { %v2236_v40 = vpop.f32.mrb[6].mxu1 }
 0x1f6   :  { %v428_v41 = vadd.f32 %v2236_v40, %v76_v38  ;;  %v422_v42 = vpop.f32.mrb[7].mxu1  ;;  %v2000_v40 = vld [vmem:[%s3248_s4 + $0x3] ss:$0 sm:$0xff] }
 0x1f7   :  { %v423_v43 = vadd.f32 %v422_v42, %v75_v39 }
 0x1f8   :  { %v433_v44 = vsel %vm431_vm2, %v428_v41, -inf }
 0x1f9   :  { %v432_v45 = vsel %vm431_vm2, %v423_v43, -inf }
 0x1fa   :  { %v434_v46 = vmax.f32 %v432_v45, %v433_v44 }
 0x1fc   :  { %v435_v47 = vrot.slane %v434_v46, 4 }
 0x1fe   :  { %v436_v48 = vmax.f32 %v434_v46, %v435_v47 }
 0x200   :  { %v437_v49 = vrot.slane %v436_v48, 2 }
 0x202   :  { %v438_v50 = vmax.f32 %v436_v48, %v437_v49 }
 0x204   :  { %v439_v51 = vrot.slane %v438_v50, 1 }
 0x206   :  { %v440_v52 = vmax.f32 %v438_v50, %v439_v51 }
 0x208   :  { %v441_v53 = vsub.f32 %v423_v43, %v440_v52  ;;  %v442_v54 = vsub.f32 %v428_v41, %v440_v52 }
 0x20a   :  { %v443_v55 = vmul.f32 1.442695, %v441_v53  ;;  %v445_v56 = vmul.f32 1.442695, %v442_v54 }
 0x20c   :  { %2585 = vpow2.f32 %v443_v55 }
 0x20d   :  { %2587 = vpow2.f32 %v445_v56 }
 0x216   :  { %v2586_v57 = vpop.eup %2585 }
 0x217   :  { %v2588_v58 = vpop.eup %2587  ;;  %v447_v59 = vsel %vm431_vm2, %v2586_v57, 0.0 }
 0x218   :  { %v448_v60 = vsel %vm431_vm2, %v2588_v58, 0.0 }
 0x219   :  { %v449_v61 = vadd.f32 %v448_v60, %v447_v59  ;;  %v756_v60 = vld [vmem:[%s3249_s5 + $0x10] sm:$0xff] }
 0x21b   :  { %v450_v62 = vrot.slane %v449_v61, 4 }
 0x21d   :  { %v451_v63 = vadd.f32 %v450_v62, %v449_v61  ;;  %v757_v61 = vld [vmem:[%s3249_s5 + $0x18] sm:$0xff] }
 0x21e   :  { %v2457_v62 = vpack.c.bf16 %v757_v61, %v756_v60 }
 0x21f   :  { %v452_v0 = vrot.slane %v451_v63, 2 }
 0x221   :  { %v453_v1 = vadd.f32 %v452_v0, %v451_v63 }
 0x223   :  { %v454_v2 = vrot.slane %v453_v1, 1 }
 0x225   :  { %v455_v3 = vadd.f32 %v454_v2, %v453_v1 }
 0x227   :  { %2589 = vrcp.f32 %v455_v3 }
 0x231   :  { %v2590_v4 = vpop.eup %2589 }
 0x232   :  { %v457_v9 = vmul.f32 %v2590_v4, %v2586_v57  ;;  %v458_v10 = vmul.f32 %v2590_v4, %v2588_v58  ;;  %v754_v57 = vld [vmem:[%s3249_s5] sm:$0xff]  ;;  %v755_v58 = vld [vmem:[%s3249_s5 + $0x8] sm:$0xff] }
 0x233   :  { %v2453_v59 = vpack.c.bf16 %v755_v58, %v754_v57 }
 0x234   :  { %v459_v11 = vmul.f32 %v457_v9, %v78_v7  ;;  %v460_v13 = vmul.f32 %v458_v10, %v79_v8  ;;  %v2003_v7 = vld [vmem:[%s3248_s4 + $0x8] ss:$0 sm:$0xff]  ;;  %v2004_v9 = vld [vmem:[%s3248_s4 + $0x9] ss:$0 sm:$0xff] }
 0x236   :  { %v2441_v14 = vpack.c.bf16 %v460_v13, %v459_v11 }
 0x238   :  { %2442 = vmatprep.subr.bf16.mxu0 %v2441_v14 }
 0x239   :  { %2444 = vmatpush3.bf16.msra.mxu0 %v2441_v14 }
 0x23a   :  { %2454 = vmatprep.subr.bf16.mxu0 %v2453_v59 }
 0x23c   :  { %2242 = vmatmul.mubr.msk.f32.vlgmr.msra.gmra.mrb[0].mxu0 %vm431_vm2, %v478_v6 }
 0x23d   :  { %2244 = vmatprep.mubr.msk.f32.mxu0 %vm431_vm2, %v479_v15  ;;  %2456 = vmatpush3.bf16.msra.mxu0 %v2453_v59 }
 0x23e   :  { %2458 = vmatprep.subr.bf16.mxu0 %v2457_v62 }
 0x240   :  { %2245 = vmatmul.mubr.msk.f32.gmra.mrb[2].mxu0 %vm431_vm2, %v480_v16 }
 0x241   :  { %2460 = vmatpush3.bf16.msra.mxu0 %v2457_v62 }
 0x30f   :  { %v2243_v23 = vpop.f32.mrb[0].mxu0 }
 0x310   :  { %591 = vrot.lane.b32.xlu1 %v2243_v23, %s2722_s18  ;;  %v571_v24 = vpop.f32.mrb[1].mxu0 }
 0x311   :  { %608 = vrot.lane.b32.xlu0 %v571_v24, %s2724_s13 }
 0x313   :  { %v2246_v26 = vpop.f32.mrb[2].mxu0 }
 0x314   :  { %599 = vrot.lane.b32.xlu1 %v2246_v26, %s2725_s14  ;;  %v581_v27 = vpop.f32.mrb[3].mxu0 }
 0x318   :  { %595 = vrot.lane.b32.xlu1 %v581_v27, %s2726_s15 }
 0x31c   :  { %611 = vrot.lane.b32.xlu1 %v581_v27, %s2722_s18  ;;  %v904_v27 = vld [vmem:[%s3250_s6 + $0x30] sm:$0xff] }
 0x320   :  { %614 = vrot.lane.b32.xlu1 %v2246_v26, %s2726_s15 }
 0x382   :  { %v592_v28 = vpop.permute.xlu1 %591 }
 0x383   :  { %v603_v30 = vsel %vm602_vm3, %v571_v24, %v592_v28  ;;  %v609_v34 = vpop.permute.xlu0 %608  ;;  %v903_v24 = vld [vmem:[%s3250_s6 + $0x28] sm:$0xff]  ;;  %v905_v28 = vld [vmem:[%s3250_s6 + $0x38] sm:$0xff] }
 0x384   :  { %v617_v36 = vsel %vm602_vm3, %v609_v34, %v2243_v23  ;;  %v902_v23 = vld [vmem:[%s3250_s6 + $0x20] sm:$0xff]  ;;  %v909_v34 = vld [vmem:[%s3250_s6 + $0x58] sm:$0xff] }
 0x385   :  { %v2469_v26 = vpack.c.bf16 %v903_v24, %v902_v23 }
 0x386   :  { %v600_v29 = vpop.permute.xlu1 %599 }
 0x38a   :  { %v596_v31 = vpop.permute.xlu1 %595 }
 0x38b   :  { %v604_v32 = vsel %vm431_vm2, %v603_v30, %v596_v31  ;;  %v906_v30 = vld [vmem:[%s3250_s6 + $0x40] sm:$0xff]  ;;  %v907_v31 = vld [vmem:[%s3250_s6 + $0x48] sm:$0xff] }
 0x38c   :  { %v606_v33 = vsel %vm605_vm4, %v604_v32, %v600_v29  ;;  %v2473_v29 = vpack.c.bf16 %v905_v28, %v904_v27  ;;  %v2477_v32 = vpack.c.bf16 %v907_v31, %v906_v30 }
 0x38d   :  { %2255 = vmatprep.mubr.msk.f32.mxu1 %vm92_vm0, %v606_v33  ;;  %v908_v33 = vld [vmem:[%s3250_s6 + $0x50] sm:$0xff] }
 0x38e   :  { %v612_v35 = vpop.permute.xlu1 %611 }
 0x38f   :  { %v618_v37 = vsel %vm431_vm2, %v617_v36, %v612_v35  ;;  %v2481_v35 = vpack.c.bf16 %v909_v34, %v908_v33  ;;  %v910_v36 = vld [vmem:[%s3250_s6 + $0x60] sm:$0xff] }
 0x392   :  { %v615_v38 = vpop.permute.xlu1 %614 }
 0x393   :  { %v619_v39 = vsel %vm605_vm4, %v618_v37, %v615_v38  ;;  %v911_v37 = vld [vmem:[%s3250_s6 + $0x68] sm:$0xff] }
 0x394   :  { %2256 = vmatmul.mubr.msk.f32.vlgmr.msra.gmra.mrb[8].mxu1 %vm92_vm0, %v619_v39  ;;  %v2485_v38 = vpack.c.bf16 %v911_v37, %v910_v36  ;;  %v912_v39 = vld [vmem:[%s3250_s6 + $0x70] sm:$0xff]  ;;  %v2012_v36 = vld [vmem:[%s3248_s4 + $0xe] ss:$0 sm:$0xff] }
 0x395   :  { %2464 = vmatpush3.bf16.msra.mxu1 %v2461_v19 }
 0x396   :  { %2466 = vmatprep.subr.bf16.mxu1 %v2465_v22 }
 0x399   :  { %2468 = vmatpush3.bf16.msra.mxu1 %v2465_v22 }
 0x39a   :  { %2470 = vmatprep.subr.bf16.mxu1 %v2469_v26 }
 0x39d   :  { %2472 = vmatpush3.bf16.msra.mxu1 %v2469_v26 }
 0x39e   :  { %2474 = vmatprep.subr.bf16.mxu1 %v2473_v29 }
 0x3a1   :  { %2476 = vmatpush3.bf16.msra.mxu1 %v2473_v29 }
 0x3a2   :  { %2478 = vmatprep.subr.bf16.mxu1 %v2477_v32 }
 0x3a5   :  { %2480 = vmatpush3.bf16.msra.mxu1 %v2477_v32 }
 0x3a6   :  { %2482 = vmatprep.subr.bf16.mxu1 %v2481_v35 }
 0x3a9   :  { %2484 = vmatpush3.bf16.msra.mxu1 %v2481_v35 }
 0x3aa   :  { %2486 = vmatprep.subr.bf16.mxu1 %v2485_v38 }
 0x3ad   :  { %2488 = vmatpush3.bf16.msra.mxu1 %v2485_v38 }
 0x467   :  { %v2257_v41 = vpop.f32.mrb[8].mxu1 }
 0x468   :  { %v702_v42 = vpop.f32.mrb[9].mxu1  ;;  %v708_v43 = vadd.f32 %v2257_v41, %v2000_v40 }
 0x469   :  { %v703_v44 = vadd.f32 %v2000_v40, %v702_v42  ;;  %v913_v40 = vld [vmem:[%s3250_s6 + $0x78] sm:$0xff]  ;;  %v2005_v42 = vld [vmem:[%s3251_s7] ss:$0 sm:$0xff] }
 0x46a   :  { %v2939_v46 = vadd.f32 %v708_v43, %v2853_v12  ;;  %v2489_v41 = vpack.c.bf16 %v913_v40, %v912_v39 }
 0x46b   :  { %v2936_v45 = vadd.f32 %v703_v44, %v2837_v5 }
 0x46c   :  { %v716_v48 = vsel %vm92_vm0, %v2939_v46, 0.0  ;;  %2490 = vmatprep.subr.bf16.mxu1 %v2489_v41 }
 0x46d   :  { %v713_v47 = vsel %vm92_vm0, %v2936_v45, 0.0  ;;  %2492 = vmatpush3.bf16.msra.mxu1 %v2489_v41 }
 0x46e   :  { %714 = vadd.xlane.f32.xlu1 %v713_v47 }
 0x472   :  { %717 = vadd.xlane.f32.xlu1 %v716_v48 }
 0x4fb   :  { %v715_v49 = vpop.xlane.xlu1 %714 }
 0x4fc   :  { %v720_v50 = vmul.f32 0.03125, %v715_v49 }
 0x4fe   :  { %v722_v51 = vsub.f32 %v2936_v45, %v720_v50 }
 0x4ff   :  { %v718_v52 = vpop.xlane.xlu1 %717 }
 0x500   :  { %v721_v53 = vmul.f32 0.03125, %v718_v52  ;;  %v724_v54 = vmul.f32 %v722_v51, %v722_v51 }
 0x502   :  { %v723_v5 = vsub.f32 %v2939_v46, %v721_v53  ;;  %v726_v12 = vsel %vm92_vm0, %v724_v54, 0.0 }
 0x503   :  { %727 = vadd.xlane.f32.xlu0 %v726_v12 }
 0x504   :  { %v725_v55 = vmul.f32 %v723_v5, %v723_v5 }
 0x506   :  { %v729_v56 = vsel %vm92_vm0, %v725_v55, 0.0 }
 0x507   :  { %730 = vadd.xlane.f32.xlu1 %v729_v56 }
 0x590   :  { %v728_v63 = vpop.xlane.xlu0 %727 }
 0x591   :  { %v732_v0 = vmul.f32 0.03125, %v728_v63 }
 0x593   :  { %v734_v1 = vadd.f32 1e-05, %v732_v0 }
 0x594   :  { %v731_v2 = vpop.xlane.xlu1 %730 }
 0x595   :  { %2591 = vrsqrt.f32 %v734_v1  ;;  %v733_v3 = vmul.f32 0.03125, %v731_v2 }
 0x597   :  { %v735_v4 = vadd.f32 1e-05, %v733_v3 }
 0x599   :  { %2593 = vrsqrt.f32 %v735_v4 }
 0x59f   :  { %v2592_v6 = vpop.eup %2591 }
 0x5a0   :  { %v738_v8 = vmul.f32 %v2592_v6, %v722_v51 }
 0x5a2   :  { %v745_v10 = vmul.f32 %v2003_v7, %v738_v8 }
 0x5a3   :  { %v2594_v11 = vpop.eup %2593 }
 0x5a4   :  { %v739_v13 = vmul.f32 %v2594_v11, %v723_v5  ;;  %v752_v14 = vadd.f32 %v2004_v9, %v745_v10 }
 0x5a6   :  { %v746_v15 = vmul.f32 %v2003_v7, %v739_v13  ;;  %2266 = vmatprep.mubr.msk.f32.mxu0 %vm92_vm0, %v752_v14 }
 0x5a8   :  { %v753_v16 = vadd.f32 %v2004_v9, %v746_v15 }
 0x5aa   :  { %2267 = vmatmul.mubr.msk.f32.vlgmr.msra.gmra.mrb[4].mxu0 %vm92_vm0, %v753_v16 }
 0x67d   :  { %v2268_v43 = vpop.f32.mrb[4].mxu0 }
 0x67e   :  { %v841_v44 = vadd.f32 %v2268_v43, %v2005_v42  ;;  %v835_v47 = vpop.f32.mrb[5].mxu0 }
 0x67f   :  { %v836_v48 = vadd.f32 %v2005_v42, %v835_v47 }
 0x680   :  { %v847_v49 = vmul.f32 0.70710677, %v841_v44  ;;  %v845_v33 = vmul.f32 0.5, %v841_v44 }
 0x681   :  { %v846_v50 = vmul.f32 0.70710677, %v836_v48  ;;  %v844_v31 = vmul.f32 0.5, %v836_v48 }
 0x682   :  { %v849_v51 = vand.u32 2147483647, %v847_v49  ;;  %vm889_vm5 = vcmp.ge.f32.partialorder %v847_v49, 0.0 }
 0x683   :  { %v848_v52 = vand.u32 2147483647, %v846_v50  ;;  %vm888_vm6 = vcmp.ge.f32.partialorder %v846_v50, 0.0 }
 0x684   :  { %v851_v53 = vmul.f32 0.3275911, %v849_v51  ;;  %v877_v55 = vsub.f32 0.0, %v849_v51 }
 0x685   :  { %v850_v54 = vmul.f32 0.3275911, %v848_v52  ;;  %v876_v56 = vsub.f32 0.0, %v848_v52 }
 0x686   :  { %v853_v5 = vadd.f32 1.0, %v851_v53  ;;  %v879_v58 = vmul.f32 %v877_v55, %v849_v51 }
 0x687   :  { %v852_v12 = vadd.f32 1.0, %v850_v54  ;;  %v878_v61 = vmul.f32 %v876_v56, %v848_v52  ;;  %v2017_v56 = vld [vmem:[%s3247_s3 + $0x90] sm:$0xff] }
 0x688   :  { %2595 = vrcp.f32 %v853_v5  ;;  %v882_v0 = vmul.f32 1.442695, %v879_v58  ;;  %v2015_v5 = vld [vmem:[%s3247_s3 + $0x80] sm:$0xff] }
 0x689   :  { %2597 = vrcp.f32 %v852_v12  ;;  %v880_v3 = vmul.f32 1.442695, %v878_v61  ;;  %v2016_v12 = vld [vmem:[%s3247_s3 + $0x88] sm:$0xff] }
 0x68a   :  { %2599 = vpow2.f32 %v882_v0  ;;  %v2493_v55 = vpack.c.bf16 %v2016_v12, %v2015_v5 }
 0x68b   :  { %2601 = vpow2.f32 %v880_v3 }
 0x68c   :  { %2494 = vmatprep.subr.bf16.mxu0 %v2493_v55 }
 0x68d   :  { %2496 = vmatpush3.bf16.msra.mxu0 %v2493_v55 }
 0x692   :  { %v2596_v57 = vpop.eup %2595 }
 0x693   :  { %v2598_v59 = vpop.eup %2597  ;;  %v859_v60 = vmul.f32 1.0614054, %v2596_v57 }
 0x694   :  { %v858_v62 = vmul.f32 1.0614054, %v2598_v59  ;;  %v2600_v18 = vpop.eup %2599 }
 0x695   :  { %v2009_v63 = vadd.f32 -1.4531521, %v859_v60  ;;  %v2602_v20 = vpop.eup %2601  ;;  %v2023_v60 = vld [vmem:[%s3247_s3 + $0xa8] sm:$0xff] }
 0x696   :  { %v2008_v1 = vadd.f32 -1.4531521, %v858_v62 }
 0x697   :  { %v863_v2 = vmul.f32 %v2596_v57, %v2009_v63 }
 0x698   :  { %v862_v4 = vmul.f32 %v2598_v59, %v2008_v1 }
 0x699   :  { %v865_v6 = vadd.f32 1.4214138, %v863_v2 }
 0x69a   :  { %v864_v7 = vadd.f32 1.4214138, %v862_v4 }
 0x69b   :  { %v867_v8 = vmul.f32 %v2596_v57, %v865_v6  ;;  %v2013_v6 = vld [vmem:[%s3248_s4 + $0xa] ss:$0 sm:$0xff] }
 0x69c   :  { %v866_v9 = vmul.f32 %v2598_v59, %v864_v7 }
 0x69d   :  { %v2011_v10 = vadd.f32 -0.28449672, %v867_v8  ;;  %v2014_v8 = vld [vmem:[%s3248_s4 + $0xb] ss:$0 sm:$0xff] }
 0x69e   :  { %v2010_v11 = vadd.f32 -0.28449672, %v866_v9 }
 0x69f   :  { %v871_v13 = vmul.f32 %v2596_v57, %v2011_v10 }
 0x6a0   :  { %v870_v14 = vmul.f32 %v2598_v59, %v2010_v11 }
 0x6a1   :  { %v873_v15 = vadd.f32 0.2548296, %v871_v13 }
 0x6a2   :  { %v872_v16 = vadd.f32 0.2548296, %v870_v14  ;;  %v2024_v14 = vld [vmem:[%s3247_s3 + $0xb0] sm:$0xff] }
 0x6a3   :  { %v875_v17 = vmul.f32 %v2596_v57, %v873_v15  ;;  %v2018_v57 = vld [vmem:[%s3247_s3 + $0x98] sm:$0xff] }
 0x6a4   :  { %v874_v19 = vmul.f32 %v2598_v59, %v872_v16  ;;  %v2497_v58 = vpack.c.bf16 %v2018_v57, %v2017_v56  ;;  %v2022_v59 = vld [vmem:[%s3247_s3 + $0xa0] sm:$0xff]  ;;  %v2025_v15 = vld [vmem:[%s3247_s3 + $0xb8] sm:$0xff] }
 0x6a5   :  { %v885_v21 = vmul.f32 %v2600_v18, %v875_v17  ;;  %v2501_v61 = vpack.c.bf16 %v2023_v60, %v2022_v59  ;;  %v2505_v18 = vpack.c.bf16 %v2025_v15, %v2024_v14 }
 0x6a6   :  { %v884_v22 = vmul.f32 %v2602_v20, %v874_v19  ;;  %2498 = vmatprep.subr.bf16.mxu0 %v2497_v58  ;;  %v73_v19 = vld [vmem:[#allocation5] sm:$0xff]  ;;  %v2029_v20 = vld [vmem:[%s3247_s3 + $0xc0] sm:$0xff] }
 0x6a7   :  { %v887_v23 = vsub.f32 1.0, %v885_v21  ;;  %2500 = vmatpush3.bf16.msra.mxu0 %v2497_v58  ;;  %v2030_v21 = vld [vmem:[%s3247_s3 + $0xc8] sm:$0xff] }
 0x6a8   :  { %v886_v24 = vsub.f32 1.0, %v884_v22  ;;  %2502 = vmatprep.subr.bf16.mxu0 %v2501_v61  ;;  %v2509_v22 = vpack.c.bf16 %v2030_v21, %v2029_v20  ;;  %v2045_v20 = vld [vmem:[%s3247_s3 + $0xe8] sm:$0xff] }
 0x6a9   :  { %v891_v26 = vsub.f32 0.0, %v887_v23 }
 0x6aa   :  { %v890_v27 = vsub.f32 0.0, %v886_v24 }
 0x6ab   :  { %v893_v28 = vsel %vm889_vm5, %v887_v23, %v891_v26  ;;  %v2031_v23 = vld [vmem:[%s3247_s3 + $0xd0] sm:$0xff]  ;;  %v74_v26 = vld [vmem:[#allocation5 + $0x8] sm:$0xff] }
 0x6ac   :  { %v895_v29 = vadd.f32 1.0, %v893_v28  ;;  %v892_v30 = vsel %vm888_vm6, %v886_v24, %v890_v27  ;;  %v2032_v24 = vld [vmem:[%s3247_s3 + $0xd8] sm:$0xff]  ;;  %v2019_v28 = vld [vmem:[%s3248_s4 + $0x4] ss:$0 sm:$0xff] }
 0x6ad   :  { %v894_v32 = vadd.f32 1.0, %v892_v30  ;;  %v2513_v27 = vpack.c.bf16 %v2032_v24, %v2031_v23  ;;  %v2046_v24 = vld [vmem:[%s3247_s3 + $0xf0] sm:$0xff] }
 0x6ae   :  { %v897_v35 = vmul.f32 %v895_v29, %v845_v33 }
 0x6af   :  { %v896_v34 = vmul.f32 %v894_v32, %v844_v31 }
 0x6b1   :  { %2301 = vmatprep.mubr.f32.mxu1 %v896_v34  ;;  %v2026_v34 = vld [vmem:[%s3248_s4 + $0x5] ss:$0 sm:$0xff] }
 0x6b2   :  { %2302 = vmatmul.mubr.f32.vlgmr.msra.gmra.mrb[10].mxu1 %v897_v35 }
 0x785   :  { %v2303_v37 = vpop.f32.mrb[10].mxu1 }
 0x786   :  { %v985_v38 = vpop.f32.mrb[11].mxu1  ;;  %v991_v39 = vadd.f32 %v2303_v37, %v2012_v36 }
 0x787   :  { %v986_v40 = vadd.f32 %v2012_v36, %v985_v38 }
 0x788   :  { %v3027_v42 = vadd.f32 %v991_v39, %v2939_v46  ;;  %v2033_v39 = vld [vmem:[%s3248_s4 + $0x6] ss:$0 sm:$0xff] }
 0x789   :  { %v3024_v41 = vadd.f32 %v986_v40, %v2936_v45 }
 0x78a   :  { %v999_v44 = vsel %vm92_vm0, %v3027_v42, 0.0 }
 0x78b   :  { %v996_v43 = vsel %vm92_vm0, %v3024_v41, 0.0 }
 0x78c   :  { %997 = vadd.xlane.f32.xlu1 %v996_v43 }
 0x790   :  { %1000 = vadd.xlane.f32.xlu1 %v999_v44 }
 0x819   :  { %v998_v47 = vpop.xlane.xlu1 %997 }
 0x81a   :  { %v1002_v48 = vmul.f32 0.03125, %v998_v47 }
 0x81c   :  { %v1004_v49 = vsub.f32 %v3024_v41, %v1002_v48  ;;  %v82_v48 = vld [vmem:[#allocation7 + $0x28] sm:$0xff] }
 0x81d   :  { %v1001_v50 = vpop.xlane.xlu1 %1000 }
 0x81e   :  { %v1003_v51 = vmul.f32 0.03125, %v1001_v50  ;;  %v1006_v52 = vmul.f32 %v1004_v49, %v1004_v49 }
 0x820   :  { %v1005_v45 = vsub.f32 %v3027_v42, %v1003_v51  ;;  %v1008_v46 = vsel %vm92_vm0, %v1006_v52, 0.0 }
 0x821   :  { %1009 = vadd.xlane.f32.xlu1 %v1008_v46 }
 0x822   :  { %v1007_v53 = vmul.f32 %v1005_v45, %v1005_v45 }
 0x824   :  { %v1011_v54 = vsel %vm92_vm0, %v1007_v53, 0.0 }
 0x825   :  { %1012 = vadd.xlane.f32.xlu1 %v1011_v54 }
 0x8ae   :  { %v1010_v62 = vpop.xlane.xlu1 %1009 }
 0x8af   :  { %v1014_v63 = vmul.f32 0.03125, %v1010_v62 }
 0x8b1   :  { %v1016_v0 = vadd.f32 1e-05, %v1014_v63 }
 0x8b2   :  { %v1013_v1 = vpop.xlane.xlu1 %1012 }
 0x8b3   :  { %2603 = vrsqrt.f32 %v1016_v0  ;;  %v1015_v2 = vmul.f32 0.03125, %v1013_v1 }
 0x8b5   :  { %v1017_v3 = vadd.f32 1e-05, %v1015_v2 }
 0x8b7   :  { %2605 = vrsqrt.f32 %v1017_v3 }
 0x8bd   :  { %v2604_v4 = vpop.eup %2603 }
 0x8be   :  { %v1020_v7 = vmul.f32 %v2604_v4, %v1004_v49  ;;  %v81_v49 = vld [vmem:[#allocation7 + $0x20] sm:$0xff] }
 0x8c0   :  { %v1027_v9 = vmul.f32 %v2013_v6, %v1020_v7 }
 0x8c1   :  { %v2606_v10 = vpop.eup %2605 }
 0x8c2   :  { %v1021_v11 = vmul.f32 %v2606_v10, %v1005_v45  ;;  %v1034_v13 = vadd.f32 %v2014_v8, %v1027_v9 }
 0x8c4   :  { %v1028_v16 = vmul.f32 %v2013_v6, %v1021_v11  ;;  %2312 = vmatprep.mubr.msk.f32.mxu0 %vm92_vm0, %v1034_v13 }
 0x8c6   :  { %v1035_v17 = vadd.f32 %v2014_v8, %v1028_v16 }
 0x8c8   :  { %2313 = vmatmul.mubr.msk.f32.vlgmr.msra.gmra.mrb[6].mxu0 %vm92_vm0, %v1035_v17 }
 0x8c9   :  { %2504 = vmatpush3.bf16.msra.mxu0 %v2501_v61  ;;  %2323 = vmatprep.mubr.msk.f32.mxu0 %vm92_vm0, %v73_v19 }
 0x8ca   :  { %2506 = vmatprep.subr.bf16.mxu0 %v2505_v18 }
 0x8cd   :  { %2508 = vmatpush3.bf16.msra.mxu0 %v2505_v18 }
 0x8ce   :  { %2510 = vmatprep.subr.bf16.mxu0 %v2509_v22 }
 0x8d0   :  { %2324 = vmatmul.mubr.msk.f32.vlgmr.msra.gmra.mrb[8].mxu0 %vm92_vm0, %v74_v26 }
 0x8d1   :  { %2512 = vmatpush3.bf16.msra.mxu0 %v2509_v22  ;;  %2334 = vmatprep.mubr.msk.f32.mxu0 %vm92_vm0, %v73_v19  ;;  %v2044_v19 = vld [vmem:[%s3247_s3 + $0xe0] sm:$0xff] }
 0x8d2   :  { %2514 = vmatprep.subr.bf16.mxu0 %v2513_v27  ;;  %v2527_v21 = vpack.c.bf16 %v2045_v20, %v2044_v19  ;;  %v2065_v19 = vld [vmem:[%s3250_s6 + $0x88] sm:$0xff] }
 0x8d5   :  { %2516 = vmatpush3.bf16.msra.mxu0 %v2513_v27 }
 0x8d8   :  { %2335 = vmatmul.mubr.msk.f32.vlgmr.msra.gmra.mrb[10].mxu0 %vm92_vm0, %v74_v26  ;;  %v2047_v26 = vld [vmem:[%s3247_s3 + $0xf8] sm:$0xff]  ;;  %s2691_s3 = scalar_lea.vmem %s1959_s27, 256 }
 0x8d9   :  { %v2531_v27 = vpack.c.bf16 %v2047_v26, %v2046_v24  ;;  %v2068_v24 = vld [vmem:[%s3250_s6 + $0xa0] sm:$0xff]  ;;  %v2069_v26 = vld [vmem:[%s3250_s6 + $0xa8] sm:$0xff]  ;;  %p2692_p10 = scmp.ne.s32.totalorder %s1959_s27, %s2691_s3  ;;  %p2697_p12 = scmp.lt.s32.totalorder %s2691_s3, %s2691_s3 }
 0x8db   :  { %p2698_p13 = por %p2697_p12, %p2696_p11 }
 0x8dd   :  { %p2699_p0 = pnand %p2698_p13, %p2692_p10 }
 0x99b   :  { %v2314_v29 = vpop.f32.mrb[6].mxu0 }
 0x99c   :  { %v1124_v30 = vadd.f32 %v2314_v29, %v2019_v28  ;;  %v1118_v31 = vpop.f32.mrb[7].mxu0 }
 0x99d   :  { %v1119_v32 = vadd.f32 %v2019_v28, %v1118_v31 }
 0x99f   :  { %v2517_v33 = vpack.c.bf16 %v1124_v30, %v1119_v32 }
 0x9a1   :  { %2519 = vmatprep.subr.msk.bf16.mxu0 %vm2882_vm1, %v2517_v33 }
 0x9a2   :  { %2522 = vmatpush3.bf16.xpose.msk.msra.mxu0 %vm2882_vm1, %v2517_v33 }
 0x9a3   :  { %v2325_v35 = vpop.f32.mrb[8].mxu0  ;;  %2528 = vmatprep.subr.bf16.mxu0 %v2527_v21 }
 0x9a4   :  { %v1209_v36 = vpop.f32.mrb[9].mxu0  ;;  %v1215_v38 = vadd.f32 %v2325_v35, %v2026_v34 }
 0x9a5   :  { %v1210_v37 = vadd.f32 %v2026_v34, %v1209_v36 }
 0x9a7   :  { %2341 = vmatprep.mubr.msk.f32.mxu0 %vm92_vm0, %v1210_v37 }
 0x9a9   :  { %2342 = vmatmul.mubr.msk.f32.vlgmr.msra.gmra.mrb[12].mxu0 %vm92_vm0, %v1215_v38 }
 0x9aa   :  { %2530 = vmatpush3.bf16.msra.mxu0 %v2527_v21  ;;  %v2066_v21 = vld [vmem:[%s3250_s6 + $0x90] sm:$0xff] }
 0x9ab   :  { %v2336_v40 = vpop.f32.mrb[10].mxu0  ;;  %2532 = vmatprep.subr.bf16.mxu0 %v2531_v27 }
 0x9ac   :  { %v1294_v43 = vpop.f32.mrb[11].mxu0  ;;  %v1300_v44 = vadd.f32 %v2336_v40, %v2033_v39 }
 0x9ad   :  { %v1295_v25 = vadd.f32 %v2033_v39, %v1294_v43 }
 0x9ae   :  { %2534 = vmatpush3.bf16.msra.mxu0 %v2531_v27  ;;  %v2551_v27 = vpack.c.bf16 %v2069_v26, %v2068_v24 }
 0x9af   :  { %1417 = vxpose.xlu1.b32.start [1/2] (short) (narrow) %v1295_v25, 32  ;;  %v2048_v25 = vld [vmem:[%s3248_s4 + $0x7] ss:$0 sm:$0xff] }
 0x9b3   :  { %1418 = vxpose.xlu1.b32.end [2/2] (short) (narrow) %v1300_v44, 32 }
 0xa2f   :  { %v1433_v47 = vpop.trf.xlu1 }
 0xa30   :  { %2348 = vmatprep.mubr.msk.f32.mxu1 %vm431_vm2, %v1433_v47 }
 0xa33   :  { %v1434_v11 = vpop.trf.xlu1 }
 0xa37   :  { %v1435_v17 = vpop.trf.xlu1 }
 0xa3b   :  { %v1436_v18 = vpop.trf.xlu1 }
 0xa7c   :  { %v2343_v50 = vpop.f32.mrb[12].mxu0 }
 0xa7d   :  { %v1387_v51 = vadd.f32 %v2343_v50, %v82_v48  ;;  %v1381_v52 = vpop.f32.mrb[13].mxu0 }
 0xa7e   :  { %v1382_v45 = vadd.f32 %v1381_v52, %v81_v49 }
 0xa7f   :  { %v1391_v46 = vsel %vm431_vm2, %v1387_v51, -inf }
 0xa80   :  { %v1390_v53 = vsel %vm431_vm2, %v1382_v45, -inf }
 0xa81   :  { %v1392_v54 = vmax.f32 %v1390_v53, %v1391_v46 }
 0xa83   :  { %v1393_v5 = vrot.slane %v1392_v54, 4 }
 0xa85   :  { %v1394_v12 = vmax.f32 %v1392_v54, %v1393_v5 }
 0xa87   :  { %v1395_v55 = vrot.slane %v1394_v12, 2 }
 0xa89   :  { %v1396_v56 = vmax.f32 %v1394_v12, %v1395_v55 }
 0xa8b   :  { %v1397_v57 = vrot.slane %v1396_v56, 1 }
 0xa8d   :  { %v1398_v58 = vmax.f32 %v1396_v56, %v1397_v57 }
 0xa8f   :  { %v1399_v59 = vsub.f32 %v1382_v45, %v1398_v58  ;;  %v1400_v60 = vsub.f32 %v1387_v51, %v1398_v58  ;;  %v2053_v58 = vld [vmem:[%s3249_s5 + $0x20] sm:$0xff] }
 0xa91   :  { %v1401_v61 = vmul.f32 1.442695, %v1399_v59  ;;  %v1403_v62 = vmul.f32 1.442695, %v1400_v60  ;;  %v2054_v59 = vld [vmem:[%s3249_s5 + $0x28] sm:$0xff] }
 0xa92   :  { %v2535_v60 = vpack.c.bf16 %v2054_v59, %v2053_v58 }
 0xa93   :  { %2607 = vpow2.f32 %v1401_v61  ;;  %v2055_v61 = vld [vmem:[%s3249_s5 + $0x30] sm:$0xff] }
 0xa94   :  { %2609 = vpow2.f32 %v1403_v62  ;;  %v2056_v62 = vld [vmem:[%s3249_s5 + $0x38] sm:$0xff] }
 0xa9d   :  { %v2608_v63 = vpop.eup %2607 }
 0xa9e   :  { %v2610_v0 = vpop.eup %2609  ;;  %v1405_v1 = vsel %vm431_vm2, %v2608_v63, 0.0 }
 0xa9f   :  { %v1406_v2 = vsel %vm431_vm2, %v2610_v0, 0.0 }
 0xaa0   :  { %v1407_v3 = vadd.f32 %v1406_v2, %v1405_v1 }
 0xaa2   :  { %v1408_v4 = vrot.slane %v1407_v3, 4 }
 0xaa4   :  { %v1409_v6 = vadd.f32 %v1408_v4, %v1407_v3 }
 0xaa6   :  { %v1410_v7 = vrot.slane %v1409_v6, 2 }
 0xaa8   :  { %v1411_v8 = vadd.f32 %v1410_v7, %v1409_v6 }
 0xaaa   :  { %v1412_v9 = vrot.slane %v1411_v8, 1 }
 0xaac   :  { %v1413_v10 = vadd.f32 %v1412_v9, %v1411_v8  ;;  %v2051_v8 = vld [vmem:[%s3248_s4 + $0xc] ss:$0 sm:$0xff] }
 0xaae   :  { %2611 = vrcp.f32 %v1413_v10  ;;  %v2052_v10 = vld [vmem:[%s3248_s4 + $0xd] ss:$0 sm:$0xff] }
 0xab8   :  { %v2612_v13 = vpop.eup %2611 }
 0xab9   :  { %v1415_v14 = vmul.f32 %v2612_v13, %v2608_v63  ;;  %v1416_v15 = vmul.f32 %v2612_v13, %v2610_v0  ;;  %v2539_v63 = vpack.c.bf16 %v2056_v62, %v2055_v61 }
 0xabb   :  { %v2523_v16 = vpack.c.bf16 %v1416_v15, %v1415_v14 }
 0xabd   :  { %2524 = vmatprep.subr.bf16.mxu1 %v2523_v16 }
 0xabe   :  { %2526 = vmatpush3.bf16.msra.mxu1 %v2523_v16 }
 0xabf   :  { %2536 = vmatprep.subr.bf16.mxu1 %v2535_v60 }
 0xac1   :  { %2349 = vmatmul.mubr.msk.f32.vlgmr.msra.gmra.mrb[12].mxu1 %vm431_vm2, %v1434_v11 }
 0xac2   :  { %2351 = vmatprep.mubr.msk.f32.mxu1 %vm431_vm2, %v1435_v17  ;;  %2538 = vmatpush3.bf16.msra.mxu1 %v2535_v60 }
 0xac3   :  { %2540 = vmatprep.subr.bf16.mxu1 %v2539_v63 }
 0xac5   :  { %2352 = vmatmul.mubr.msk.f32.gmra.mrb[14].mxu1 %vm431_vm2, %v1436_v18  ;;  %v2064_v18 = vld [vmem:[%s3250_s6 + $0x80] sm:$0xff] }
 0xac6   :  { %2542 = vmatpush3.bf16.msra.mxu1 %v2539_v63  ;;  %v2543_v20 = vpack.c.bf16 %v2065_v19, %v2064_v18 }
 0xac8   :  { %2544 = vmatprep.subr.bf16.mxu0 %v2543_v20 }
 0xb94   :  { %v2350_v22 = vpop.f32.mrb[12].mxu1 }
 0xb95   :  { %1547 = vrot.lane.b32.xlu0 %v2350_v22, %s2722_s18  ;;  %v1527_v23 = vpop.f32.mrb[13].mxu1 }
 0xb98   :  { %v2353_v28 = vpop.f32.mrb[14].mxu1 }
 0xb99   :  { %1562 = vrot.lane.b32.xlu0 %v1527_v23, %s2724_s13  ;;  %v1537_v29 = vpop.f32.mrb[15].mxu1 }
 0xb9d   :  { %1555 = vrot.lane.b32.xlu0 %v2353_v28, %s2725_s14 }
 0xba1   :  { %1551 = vrot.lane.b32.xlu0 %v1537_v29, %s2726_s15 }
 0xba5   :  { %1565 = vrot.lane.b32.xlu0 %v1537_v29, %s2722_s18  ;;  %v2071_v29 = vld [vmem:[%s3250_s6 + $0xb8] sm:$0xff] }
 0xba9   :  { %1568 = vrot.lane.b32.xlu0 %v2353_v28, %s2726_s15  ;;  %v2070_v28 = vld [vmem:[%s3250_s6 + $0xb0] sm:$0xff] }
 0xc07   :  { %v1548_v30 = vpop.permute.xlu0 %1547 }
 0xc08   :  { %v1558_v33 = vsel %vm602_vm3, %v1527_v23, %v1548_v30  ;;  %v2555_v30 = vpack.c.bf16 %v2071_v29, %v2070_v28 }
 0xc0b   :  { %v1563_v31 = vpop.permute.xlu0 %1562 }
 0xc0c   :  { %v1571_v38 = vsel %vm602_vm3, %v1563_v31, %v2350_v22  ;;  %v2067_v22 = vld [vmem:[%s3250_s6 + $0x98] sm:$0xff]  ;;  %v2072_v31 = vld [vmem:[%s3250_s6 + $0xc0] sm:$0xff] }
 0xc0d   :  { %v2547_v23 = vpack.c.bf16 %v2067_v22, %v2066_v21 }
 0xc0f   :  { %v1556_v32 = vpop.permute.xlu0 %1555 }
 0xc13   :  { %v1552_v34 = vpop.permute.xlu0 %1551 }
 0xc14   :  { %v1559_v35 = vsel %vm431_vm2, %v1558_v33, %v1552_v34  ;;  %v2074_v34 = vld [vmem:[%s3250_s6 + $0xd0] sm:$0xff] }
 0xc15   :  { %v1560_v36 = vsel %vm605_vm4, %v1559_v35, %v1556_v32  ;;  %v2073_v32 = vld [vmem:[%s3250_s6 + $0xc8] sm:$0xff]  ;;  %v2075_v35 = vld [vmem:[%s3250_s6 + $0xd8] sm:$0xff] }
 0xc16   :  { %2362 = vmatprep.mubr.msk.f32.mxu0 %vm92_vm0, %v1560_v36  ;;  %v2559_v33 = vpack.c.bf16 %v2073_v32, %v2072_v31  ;;  %v2563_v36 = vpack.c.bf16 %v2075_v35, %v2074_v34 }
 0xc17   :  { %v1566_v37 = vpop.permute.xlu0 %1565 }
 0xc18   :  { %v1572_v39 = vsel %vm431_vm2, %v1571_v38, %v1566_v37  ;;  %v2076_v37 = vld [vmem:[%s3250_s6 + $0xe0] sm:$0xff]  ;;  %v2077_v38 = vld [vmem:[%s3250_s6 + $0xe8] sm:$0xff] }
 0xc1b   :  { %v1569_v40 = vpop.permute.xlu0 %1568 }
 0xc1c   :  { %v1573_v43 = vsel %vm605_vm4, %v1572_v39, %v1569_v40  ;;  %v2567_v39 = vpack.c.bf16 %v2077_v38, %v2076_v37  ;;  %v2078_v40 = vld [vmem:[%s3250_s6 + $0xf0] sm:$0xff] }
 0xc1d   :  { %2363 = vmatmul.mubr.msk.f32.vlgmr.msra.gmra.mrb[14].mxu0 %vm92_vm0, %v1573_v43  ;;  %v2079_v43 = vld [vmem:[%s3250_s6 + $0xf8] sm:$0xff] }
 0xc1e   :  { %2546 = vmatpush3.bf16.msra.mxu0 %v2543_v20 }
 0xc1f   :  { %2548 = vmatprep.subr.bf16.mxu0 %v2547_v23 }
 0xc22   :  { %2550 = vmatpush3.bf16.msra.mxu0 %v2547_v23 }
 0xc23   :  { %2552 = vmatprep.subr.bf16.mxu0 %v2551_v27 }
 0xc26   :  { %2554 = vmatpush3.bf16.msra.mxu0 %v2551_v27 }
 0xc27   :  { %2556 = vmatprep.subr.bf16.mxu0 %v2555_v30 }
 0xc2a   :  { %2558 = vmatpush3.bf16.msra.mxu0 %v2555_v30 }
 0xc2b   :  { %2560 = vmatprep.subr.bf16.mxu0 %v2559_v33 }
 0xc2e   :  { %2562 = vmatpush3.bf16.msra.mxu0 %v2559_v33 }
 0xc2f   :  { %2564 = vmatprep.subr.bf16.mxu0 %v2563_v36 }
 0xc32   :  { %2566 = vmatpush3.bf16.msra.mxu0 %v2563_v36  ;;  %v2080_v36 = vld [vmem:[%s3248_s4 + $0xf] ss:$0 sm:$0xff] }
 0xc33   :  { %2568 = vmatprep.subr.bf16.mxu0 %v2567_v39 }
 0xc36   :  { %2570 = vmatpush3.bf16.msra.mxu0 %v2567_v39 }
 0xcf0   :  { %v2364_v44 = vpop.f32.mrb[14].mxu0 }
 0xcf1   :  { %v1662_v47 = vadd.f32 %v2364_v44, %v2048_v25  ;;  %v1656_v48 = vpop.f32.mrb[15].mxu0  ;;  %v2057_v44 = vld [vmem:[%s3251_s7 + $0x1] ss:$0 sm:$0xff] }
 0xcf2   :  { %v1657_v49 = vadd.f32 %v2048_v25, %v1656_v48  ;;  %v2571_v25 = vpack.c.bf16 %v2079_v43, %v2078_v40 }
 0xcf3   :  { %v3138_v50 = vadd.f32 %v1662_v47, %v3027_v42 }
 0xcf4   :  { %v3141_v51 = vadd.f32 %v1657_v49, %v3024_v41  ;;  %2572 = vmatprep.subr.bf16.mxu0 %v2571_v25 }
 0xcf5   :  { %v1670_v52 = vsel %vm92_vm0, %v3138_v50, 0.0  ;;  %2574 = vmatpush3.bf16.msra.mxu0 %v2571_v25 }
 0xcf6   :  { %1671 = vadd.xlane.f32.xlu1 %v1670_v52  ;;  %v1667_v45 = vsel %vm92_vm0, %v3141_v51, 0.0 }
 0xcf7   :  { %1668 = vadd.xlane.f32.xlu0 %v1667_v45 }
 0xd83   :  { %v1672_v46 = vpop.xlane.xlu1 %1671 }
 0xd84   :  { %v1674_v53 = vmul.f32 0.03125, %v1672_v46  ;;  %v1669_v54 = vpop.xlane.xlu0 %1668 }
 0xd85   :  { %v1673_v5 = vmul.f32 0.03125, %v1669_v54 }
 0xd86   :  { %v1676_v12 = vsub.f32 %v3138_v50, %v1674_v53 }
 0xd87   :  { %v1675_v42 = vsub.f32 %v3141_v51, %v1673_v5 }
 0xd88   :  { %v1678_v56 = vmul.f32 %v1676_v12, %v1676_v12 }
 0xd89   :  { %v1677_v55 = vmul.f32 %v1675_v42, %v1675_v42 }
 0xd8a   :  { %v1682_v57 = vsel %vm92_vm0, %v1678_v56, 0.0 }
 0xd8b   :  { %v1679_v41 = vsel %vm92_vm0, %v1677_v55, 0.0 }
 0xd8c   :  { %1680 = vadd.xlane.f32.xlu0 %v1679_v41 }
 0xd90   :  { %1683 = vadd.xlane.f32.xlu0 %v1682_v57 }
 0xe19   :  { %v1681_v0 = vpop.xlane.xlu0 %1680 }
 0xe1a   :  { %v1685_v1 = vmul.f32 0.03125, %v1681_v0 }
 0xe1c   :  { %v1687_v2 = vadd.f32 1e-05, %v1685_v1 }
 0xe1d   :  { %v1684_v3 = vpop.xlane.xlu0 %1683 }
 0xe1e   :  { %2613 = vrsqrt.f32 %v1687_v2  ;;  %v1686_v4 = vmul.f32 0.03125, %v1684_v3 }
 0xe20   :  { %v1688_v6 = vadd.f32 1e-05, %v1686_v4 }
 0xe22   :  { %2615 = vrsqrt.f32 %v1688_v6 }
 0xe28   :  { %v2614_v7 = vpop.eup %2613 }
 0xe29   :  { %v1691_v9 = vmul.f32 %v2614_v7, %v1675_v42 }
 0xe2b   :  { %v1698_v11 = vmul.f32 %v2051_v8, %v1691_v9 }
 0xe2c   :  { %v2616_v13 = vpop.eup %2615 }
 0xe2d   :  { %v1692_v14 = vmul.f32 %v2616_v13, %v1676_v12  ;;  %v1705_v15 = vadd.f32 %v2052_v10, %v1698_v11 }
 0xe2f   :  { %v1699_v16 = vmul.f32 %v2051_v8, %v1692_v14  ;;  %2373 = vmatprep.mubr.msk.f32.mxu1 %vm92_vm0, %v1705_v15 }
 0xe31   :  { %v1706_v17 = vadd.f32 %v2052_v10, %v1699_v16 }
 0xe33   :  { %2374 = vmatmul.mubr.msk.f32.vlgmr.msra.gmra.mrb[16].mxu1 %vm92_vm0, %v1706_v17 }
 0xf06   :  { %v2375_v47 = vpop.f32.mrb[16].mxu1 }
 0xf07   :  { %v1795_v48 = vadd.f32 %v2375_v47, %v2057_v44  ;;  %v1789_v49 = vpop.f32.mrb[17].mxu1 }
 0xf08   :  { %v1790_v52 = vadd.f32 %v2057_v44, %v1789_v49 }
 0xf09   :  { %v1801_v45 = vmul.f32 0.70710677, %v1795_v48  ;;  %v1799_v33 = vmul.f32 0.5, %v1795_v48 }
 0xf0a   :  { %v1800_v46 = vmul.f32 0.70710677, %v1790_v52  ;;  %v1798_v31 = vmul.f32 0.5, %v1790_v52 }
 0xf0b   :  { %v1803_v53 = vand.u32 2147483647, %v1801_v45  ;;  %vm1843_vm7 = vcmp.ge.f32.partialorder %v1801_v45, 0.0 }
 0xf0c   :  { %v1802_v54 = vand.u32 2147483647, %v1800_v46  ;;  %vm1842_vm8 = vcmp.ge.f32.partialorder %v1800_v46, 0.0 }
 0xf0d   :  { %v1805_v5 = vmul.f32 0.3275911, %v1803_v53  ;;  %v1831_v41 = vsub.f32 0.0, %v1803_v53 }
 0xf0e   :  { %v1804_v12 = vmul.f32 0.3275911, %v1802_v54  ;;  %v1830_v56 = vsub.f32 0.0, %v1802_v54 }
 0xf0f   :  { %v1807_v42 = vadd.f32 1.0, %v1805_v5  ;;  %v1833_v58 = vmul.f32 %v1831_v41, %v1803_v53 }
 0xf10   :  { %v1806_v55 = vadd.f32 1.0, %v1804_v12  ;;  %v1832_v61 = vmul.f32 %v1830_v56, %v1802_v54 }
 0xf11   :  { %2617 = vrcp.f32 %v1807_v42  ;;  %v1836_v0 = vmul.f32 1.442695, %v1833_v58 }
 0xf12   :  { %2619 = vrcp.f32 %v1806_v55  ;;  %v1834_v3 = vmul.f32 1.442695, %v1832_v61 }
 0xf13   :  { %2621 = vpow2.f32 %v1836_v0 }
 0xf14   :  { %2623 = vpow2.f32 %v1834_v3 }
 0xf1b   :  { %v2618_v57 = vpop.eup %2617 }
 0xf1c   :  { %v2620_v59 = vpop.eup %2619  ;;  %v1813_v60 = vmul.f32 1.0614054, %v2618_v57 }
 0xf1d   :  { %v1812_v62 = vmul.f32 1.0614054, %v2620_v59  ;;  %v2622_v18 = vpop.eup %2621 }
 0xf1e   :  { %v2061_v63 = vadd.f32 -1.4531521, %v1813_v60  ;;  %v2624_v20 = vpop.eup %2623 }
 0xf1f   :  { %v2060_v1 = vadd.f32 -1.4531521, %v1812_v62 }
 0xf20   :  { %v1817_v2 = vmul.f32 %v2618_v57, %v2061_v63 }
 0xf21   :  { %v1816_v4 = vmul.f32 %v2620_v59, %v2060_v1 }
 0xf22   :  { %v1819_v6 = vadd.f32 1.4214138, %v1817_v2 }
 0xf23   :  { %v1818_v7 = vadd.f32 1.4214138, %v1816_v4 }
 0xf24   :  { %v1821_v8 = vmul.f32 %v2618_v57, %v1819_v6 }
 0xf25   :  { %v1820_v9 = vmul.f32 %v2620_v59, %v1818_v7 }
 0xf26   :  { %v2063_v10 = vadd.f32 -0.28449672, %v1821_v8 }
 0xf27   :  { %v2062_v11 = vadd.f32 -0.28449672, %v1820_v9 }
 0xf28   :  { %v1825_v13 = vmul.f32 %v2618_v57, %v2063_v10 }
 0xf29   :  { %v1824_v14 = vmul.f32 %v2620_v59, %v2062_v11 }
 0xf2a   :  { %v1827_v15 = vadd.f32 0.2548296, %v1825_v13 }
 0xf2b   :  { %v1826_v16 = vadd.f32 0.2548296, %v1824_v14 }
 0xf2c   :  { %v1829_v17 = vmul.f32 %v2618_v57, %v1827_v15 }
 0xf2d   :  { %v1828_v19 = vmul.f32 %v2620_v59, %v1826_v16 }
 0xf2e   :  { %v1839_v21 = vmul.f32 %v2622_v18, %v1829_v17 }
 0xf2f   :  { %v1838_v22 = vmul.f32 %v2624_v20, %v1828_v19 }
 0xf30   :  { %v1841_v23 = vsub.f32 1.0, %v1839_v21 }
 0xf31   :  { %v1840_v24 = vsub.f32 1.0, %v1838_v22 }
 0xf32   :  { %v1845_v26 = vsub.f32 0.0, %v1841_v23 }
 0xf33   :  { %v1844_v27 = vsub.f32 0.0, %v1840_v24 }
 0xf34   :  { %v1847_v28 = vsel %vm1843_vm7, %v1841_v23, %v1845_v26 }
 0xf35   :  { %v1849_v29 = vadd.f32 1.0, %v1847_v28  ;;  %v1846_v30 = vsel %vm1842_vm8, %v1840_v24, %v1844_v27 }
 0xf36   :  { %v1848_v32 = vadd.f32 1.0, %v1846_v30 }
 0xf37   :  { %v1851_v35 = vmul.f32 %v1849_v29, %v1799_v33 }
 0xf38   :  { %v1850_v34 = vmul.f32 %v1848_v32, %v1798_v31 }
 0xf3a   :  { %2408 = vmatprep.mubr.f32.mxu0 %v1850_v34 }
 0xf3b   :  { %2409 = vmatmul.mubr.f32.vlgmr.msra.gmra.mrb[16].mxu0 %v1851_v35 }
0x100e   :  { %v2410_v37 = vpop.f32.mrb[16].mxu0 }
0x100f   :  { %v1946_v38 = vadd.f32 %v2410_v37, %v2080_v36  ;;  %v1940_v39 = vpop.f32.mrb[17].mxu0 }
0x1010   :  { %v1941_v40 = vadd.f32 %v2080_v36, %v1940_v39 }
0x1011   :  { %v1950_v43 = vadd.f32 %v1946_v38, %v3138_v50 }
0x1012   :  { %v1949_v25 = vadd.f32 %v1941_v40, %v3141_v51 }
0x1013   :  { %1952 = vst.msk [vmem:[#allocation8 + $0x8] sm:$0xff] %vm92_vm0, %v1950_v43 }
0x1014   :  { %1951 = vst.msk [vmem:[#allocation8] sm:$0xff] %vm92_vm0, %v1949_v25 }
0x1015   :  { %2702 = shalt.err (!%p2699_p0)
}
0x1016   :  { %s2703_s14 = scalar_lea.hbm %s3252_s8, 256 }
0x1017   :  { %p2704_p1 = scmp.ne.s32.totalorder %s3252_s8, %s2703_s14  ;;  %p2707_p2 = scmp.lt.u32.totalorder %s2703_s14, %s3252_s8 }
0x1019   :  { %p2709_p3 = pnand %p2707_p2, %p2704_p1 }
0x101b   :  { %2712 = shalt.err (!%p2709_p3)
}
0x101c   :  { %1964 = dma.vmem_to_hbm [thread:$0]  %s1959_s27, 256, %s3252_s8, [#allocation4], %s2721_s17, %s2721_s17, %s2722_s18  }
0x101d   :  { %2717 = dma.done.wait [#allocation4], 256  }
0x101e   :  { %2718 = vsyncadd [#allocation4], 4294967040 }
0x101f   :  { %1968 = vsyncpa [#allocation3], 1 }
0x1020   :  { %1969 = vsyncpa [#allocation6], 1 }
0x1021   :  { %1970 = vsyncpa [#allocation4], 1 }

</bundles_post_ra>
